<compile_context>
chip_gen: v6e
topology: v6e:2x2x1
jax: 0.10.0
libtpu: 0.0.40
codegen_flags: <defaults>
</compile_context>

<pallas_src>
import functools

import jax
import jax.numpy as jnp
from jax.experimental import pallas as pl
from jax.experimental.pallas import tpu as pltpu

# -------------------- problem sizes (small, consistent with the module) -----
N_BATCH = 2
SEQ_LEN = 64          # L
NUM_MOTIFS = 16       # M  (num_motifs)
HIDDEN = 32           # channels
RADIUS = 2
WIDTH = 2 * RADIUS + 1
DEPTH = 2
PAD = WIDTH // 2
BN_EPS = 1e-5


# -------------------------------- kernel ------------------------------------
def _srmp_kernel(m_ref, w_entry_ref, b_entry_ref,
                 conv_w_ref, conv_b_ref, bn_scale_ref, bn_shift_ref,
                 w_exit_ref, b_exit_ref, out_ref,
                 *, seq_len, depth, width, mxu_dtype):
    # Layout: channels in sublanes, (batch-folded) sequence in lanes.
    _, rows = m_ref.shape                      # (M, rows); rows = k * seq_len
    pad = width // 2

    def mxu_dot(a, b):
        # bf16 operands are an option on v6e/v7x; accumulation stays f32.
        return jnp.dot(a.astype(mxu_dtype), b.astype(mxu_dtype),
                       preferred_element_type=jnp.float32)

    m = m_ref[...].astype(jnp.float32)                         # (M, rows)

    # entry 1x1 conv: (H, M) @ (M, rows) + b -> (H, rows)
    h = mxu_dot(w_entry_ref[...], m) + b_entry_ref[...]

    # Per-column position within its own sequence (lane axis), hoisted once
    # and turned into f32 multiplicative masks reused by all depth*2 convs.
    pos = jax.lax.broadcasted_iota(jnp.int32, (1, rows), 1) % seq_len
    tap_mask = []
    for k in range(width):
        s = k - pad
        if s < 0:
            tap_mask.append((pos >= (-s)).astype(jnp.float32))   # left 'same' pad
        elif s > 0:
            tap_mask.append((pos < (seq_len - s)).astype(jnp.float32))  # right pad
        else:
            tap_mask.append(None)

    for d in range(depth):                                     # ResidualUnits
        y = h
        for c in range(2):                                     # two BN->ReLU->conv
            # hoist per-(d,c) parameter slices into locals (single load each)
            scale = bn_scale_ref[d, c]                         # (H, 1)
            shift = bn_shift_ref[d, c]                         # (H, 1)
            w_dc = conv_w_ref[d, c]                            # (H, width*H)
            b_dc = conv_b_ref[d, c]                            # (H, 1)

            # eval-mode BatchNorm folded to a per-channel affine, then ReLU
            y = jnp.maximum(y * scale + shift, 0.0)

            # width-`width` 'same' Conv1d as a single im2col matmul: shifted
            # taps built in registers (XLU lane roll) * boundary masks (masks
            # also stop taps from crossing the batch seam), stacked along the
            # sublane axis -> (width*H, rows), tile-aligned.
            taps = []
            for k in range(width):
                s = k - pad
                if s == 0:
                    taps.append(y)
                    continue
                shifted = pltpu.roll(y, shift=(-s) % rows, axis=1)
                taps.append(shifted * tap_mask[k])
            cols = jnp.concatenate(taps, axis=0)               # (width*H, rows)
            y = mxu_dot(w_dc, cols) + b_dc                     # (H, rows)
        h = h + y                                              # residual add

    # exit 1x1 conv: (M, H) @ (H, rows) + b -> (M, rows)
    infl = mxu_dot(w_exit_ref[...], h) + b_exit_ref[...]

    # MultiplyBySigmoid influence propagation; lane-dense store.
    out_ref[...] = (m * jax.nn.sigmoid(infl)).astype(out_ref.dtype)


# ------------------------------- wrapper ------------------------------------
def residual_stack_srmp(m, params, *, num_row_blocks=None,
                        mxu_dtype=jnp.float32):
    N, L, M = m.shape
    depth, _, width, _, H = params["conv_w"].shape
    rows_total = N * L

    # Host-side pre-transposes for the channels-in-sublanes layout.
    w_entry_t = params["w_entry"].T                              # (H, M)
    b_entry_t = params["b_entry"].reshape(H, 1)                  # (H, 1)
    w_exit_t = params["w_exit"].T                                # (M, H)
    b_exit_t = params["b_exit"].reshape(M, 1)                    # (M, 1)
    # im2col weight: W_T[h_out, k*H + h_in] = conv_w[d, c, k, h_in, h_out]
    conv_w_t = jnp.transpose(params["conv_w"], (0, 1, 4, 2, 3)).reshape(
        depth, 2, H, width * H)
    conv_b_t = jnp.transpose(params["conv_b"], (0, 1, 3, 2))     # (d, 2, H, 1)
    bn_scale_t = jnp.transpose(params["bn_scale"], (0, 1, 3, 2))
    bn_shift_t = jnp.transpose(params["bn_shift"], (0, 1, 3, 2))

    # Data transposed once: (M, N*L); column index = n*L + l.
    m_t = jnp.transpose(m, (2, 0, 1)).reshape(M, rows_total)

    # Row-block tiling, gated on work size: tile only when each block (at
    # whole-sequence granularity, so seam masks stay valid and no halo DMA is
    # needed) still has >= 512 lane-dense rows and stays a multiple of 128.
    # At the test size this yields grid=(1,) (splitting 128 rows would only
    # add fixed per-step overhead and duplicate the weight DMA).
    if num_row_blocks is None:
        num_row_blocks = 1
        for cand in range(N, 1, -1):            # prefer most blocks (pipelining)
            if N % cand:
                continue
            rpb = (N // cand) * L
            if rpb >= 512 and rpb % 128 == 0:
                num_row_blocks = cand
                break
    rows_per_block = rows_total // num_row_blocks

    def full_spec(a):
        nd = a.ndim
        return pl.BlockSpec(a.shape, lambda i, _nd=nd: (0,) * _nd)

    kernel = functools.partial(_srmp_kernel, seq_len=L, depth=depth,
                               width=width, mxu_dtype=mxu_dtype)

    out_t = pl.pallas_call(
        kernel,
        out_shape=jax.ShapeDtypeStruct((M, rows_total), m.dtype),
        grid_spec=pltpu.PrefetchScalarGridSpec(
            num_scalar_prefetch=0,
            grid=(num_row_blocks,),
            in_specs=[
                pl.BlockSpec((M, rows_per_block), lambda i: (0, i)),  # m slab
                full_spec(w_entry_t), full_spec(b_entry_t),
                full_spec(conv_w_t), full_spec(conv_b_t),
                full_spec(bn_scale_t), full_spec(bn_shift_t),
                full_spec(w_exit_t), full_spec(b_exit_t),
            ],
            out_specs=pl.BlockSpec((M, rows_per_block), lambda i: (0, i)),
        ),
        compiler_params=pltpu.CompilerParams(
            dimension_semantics=("parallel",),
            vmem_limit_bytes=32 * 1024 * 1024),
    )(m_t, w_entry_t, b_entry_t, conv_w_t, conv_b_t,
      bn_scale_t, bn_shift_t, w_exit_t, b_exit_t)

    return out_t.reshape(M, N, L).transpose(1, 2, 0)


# --------------------------- pure-JAX reference ------------------------------
def residual_stack_srmp_ref(m, params):
    depth, _, width, _, H = params["conv_w"].shape
    pad = width // 2
    L = m.shape[1]

    def one(mb):                                               # (L, M)
        h = mb @ params["w_entry"] + params["b_entry"]
        for d in range(depth):
            y = h
            for c in range(2):
                y = jnp.maximum(
                    y * params["bn_scale"][d, c] + params["bn_shift"][d, c], 0.0)
                ypad = jnp.pad(y, ((pad, pad), (0, 0)))
                acc = jnp.zeros((L, H), jnp.float32)
                for k in range(width):
                    acc = acc + ypad[k:k + L] @ params["conv_w"][d, c, k]
                y = acc + params["conv_b"][d, c]
            h = h + y
        infl = h @ params["w_exit"] + params["b_exit"]
        return mb * jax.nn.sigmoid(infl)

    return jax.vmap(one)(m)


# --------------------------- deterministic params ----------------------------
def make_params(key):
    ks = jax.random.split(key, 10)
    w_entry = 0.2 * jax.random.normal(ks[0], (NUM_MOTIFS, HIDDEN), jnp.float32)
    b_entry = 0.1 * jax.random.normal(ks[1], (1, HIDDEN), jnp.float32)
    conv_w = 0.1 * jax.random.normal(ks[2], (DEPTH, 2, WIDTH, HIDDEN, HIDDEN),
                                     jnp.float32)
    conv_b = 0.1 * jax.random.normal(ks[3], (DEPTH, 2, 1, HIDDEN), jnp.float32)
    # BatchNorm params (gamma, beta, running_mean, running_var) folded to affine
    gamma = 1.0 + 0.1 * jax.random.normal(ks[4], (DEPTH, 2, 1, HIDDEN), jnp.float32)
    beta = 0.1 * jax.random.normal(ks[5], (DEPTH, 2, 1, HIDDEN), jnp.float32)
    r_mean = 0.1 * jax.random.normal(ks[6], (DEPTH, 2, 1, HIDDEN), jnp.float32)
    r_var = jnp.abs(1.0 + 0.1 * jax.random.normal(ks[7], (DEPTH, 2, 1, HIDDEN),
                                                  jnp.float32))
    bn_scale = gamma / jnp.sqrt(r_var + BN_EPS)
    bn_shift = beta - r_mean * bn_scale
    w_exit = 0.2 * jax.random.normal(ks[8], (HIDDEN, NUM_MOTIFS), jnp.float32)
    b_exit = 0.1 * jax.random.normal(ks[9], (1, NUM_MOTIFS), jnp.float32)
    return dict(w_entry=w_entry, b_entry=b_entry, conv_w=conv_w, conv_b=conv_b,
                bn_scale=bn_scale, bn_shift=bn_shift,
                w_exit=w_exit, b_exit=b_exit)


# ----------------------------------- main ------------------------------------
if __name__ == "__main__":
    key = jax.random.PRNGKey(0)
    pkey, mkey = jax.random.split(key)
    params = make_params(pkey)
    m = jax.random.normal(mkey, (N_BATCH, SEQ_LEN, NUM_MOTIFS), jnp.float32)

    out = jax.block_until_ready(residual_stack_srmp(m, params))
    ref = jax.block_until_ready(residual_stack_srmp_ref(m, params))

    assert out.shape == m.shape and out.dtype == m.dtype
    assert jnp.allclose(out, ref, atol=1e-4, rtol=1e-4), "mismatch vs reference"

    print("KERNEL_OK")
</pallas_src>

<mosaic_0001>
module attributes {stable_mosaic.version = 11 : i64} {
  func.func @_srmp_kernel(%arg0: i32, %arg1: memref<16x128xf32, #tpu.memory_space<vmem>>, %arg2: memref<32x16xf32, #tpu.memory_space<vmem>>, %arg3: memref<32x1xf32, #tpu.memory_space<vmem>>, %arg4: memref<2x2x32x160xf32, #tpu.memory_space<vmem>>, %arg5: memref<2x2x32x1xf32, #tpu.memory_space<vmem>>, %arg6: memref<2x2x32x1xf32, #tpu.memory_space<vmem>>, %arg7: memref<2x2x32x1xf32, #tpu.memory_space<vmem>>, %arg8: memref<16x32xf32, #tpu.memory_space<vmem>>, %arg9: memref<16x1xf32, #tpu.memory_space<vmem>>, %arg10: memref<16x128xf32, #tpu.memory_space<vmem>>) attributes {dimension_semantics = [#tpu.dimension_semantics<parallel>], iteration_bounds = array<i64: 1>, scalar_prefetch = 0 : i64, scratch_operands = 0 : i64, tpu.core_type = #tpu.core_type<tc>, window_params = [{transform_indices = @transform_0, window_bounds = array<i64: 16, 128>}, {pipeline_mode = #tpu.pipeline_mode<synchronous>, transform_indices = @transform_1, window_bounds = array<i64: 32, 16>}, {pipeline_mode = #tpu.pipeline_mode<synchronous>, transform_indices = @transform_2, window_bounds = array<i64: 32, 1>}, {pipeline_mode = #tpu.pipeline_mode<synchronous>, transform_indices = @transform_3, window_bounds = array<i64: 2, 2, 32, 160>}, {pipeline_mode = #tpu.pipeline_mode<synchronous>, transform_indices = @transform_4, window_bounds = array<i64: 2, 2, 32, 1>}, {pipeline_mode = #tpu.pipeline_mode<synchronous>, transform_indices = @transform_5, window_bounds = array<i64: 2, 2, 32, 1>}, {pipeline_mode = #tpu.pipeline_mode<synchronous>, transform_indices = @transform_6, window_bounds = array<i64: 2, 2, 32, 1>}, {pipeline_mode = #tpu.pipeline_mode<synchronous>, transform_indices = @transform_7, window_bounds = array<i64: 16, 32>}, {pipeline_mode = #tpu.pipeline_mode<synchronous>, transform_indices = @transform_8, window_bounds = array<i64: 16, 1>}, {transform_indices = @transform_9, window_bounds = array<i64: 16, 128>}]} {
    %c0 = arith.constant 0 : index
    %c0_0 = arith.constant 0 : index
    %0 = vector.load %arg1[%c0, %c0_0] : memref<16x128xf32, #tpu.memory_space<vmem>>, vector<16x128xf32>
    %c0_1 = arith.constant 0 : index
    %c0_2 = arith.constant 0 : index
    %1 = vector.load %arg2[%c0_1, %c0_2] : memref<32x16xf32, #tpu.memory_space<vmem>>, vector<32x16xf32>
    %cst = arith.constant dense<0.000000e+00> : vector<32x128xf32>
    %2 = tpu.matmul %1, %0, %cst {dimension_numbers = #tpu.dot_dimension_numbers<[1], [0], [0], [1], [0, 0, 1, 1], [], []>} : vector<32x16xf32>, vector<16x128xf32>, vector<32x128xf32> -> vector<32x128xf32>
    %c0_3 = arith.constant 0 : index
    %c0_4 = arith.constant 0 : index
    %3 = vector.load %arg3[%c0_3, %c0_4] : memref<32x1xf32, #tpu.memory_space<vmem>>, vector<32x1xf32>
    %4 = vector.broadcast %3 : vector<32x1xf32> to vector<32x128xf32>
    %5 = arith.addf %2, %4 : vector<32x128xf32>
    %6 = tpu.iota {dimensions = array<i32: 1>} : vector<1x128xi32>
    %c64_i32 = arith.constant 64 : i32
    %c0_i32 = arith.constant 0 : i32
    %7 = arith.cmpi eq, %c64_i32, %c0_i32 : i32
    %c1_i32 = arith.constant 1 : i32
    %8 = arith.select %7, %c1_i32, %c64_i32 : i32
    %9 = vector.broadcast %8 : i32 to vector<1x128xi32>
    %10 = arith.remsi %6, %9 : vector<1x128xi32>
    %c0_i32_5 = arith.constant 0 : i32
    %11 = vector.broadcast %c0_i32_5 : i32 to vector<1x128xi32>
    %12 = arith.cmpi ne, %10, %11 : vector<1x128xi32>
    %c0_i32_6 = arith.constant 0 : i32
    %13 = vector.broadcast %c0_i32_6 : i32 to vector<1x128xi32>
    %14 = arith.cmpi slt, %10, %13 : vector<1x128xi32>
    %c0_i32_7 = arith.constant 0 : i32
    %15 = arith.cmpi slt, %8, %c0_i32_7 : i32
    %16 = vector.broadcast %15 : i1 to vector<1x128xi1>
    %17 = vector.broadcast %16 : vector<1x128xi1> to vector<1x128xi1>
    %18 = arith.xori %14, %17 : vector<1x128xi1>
    %19 = arith.andi %18, %12 : vector<1x128xi1>
    %20 = vector.broadcast %8 : i32 to vector<1x128xi32>
    %21 = arith.addi %10, %20 : vector<1x128xi32>
    %22 = arith.select %19, %21, %10 : vector<1x128xi1>, vector<1x128xi32>
    %c2_i32 = arith.constant 2 : i32
    %23 = vector.broadcast %c2_i32 : i32 to vector<1x128xi32>
    %24 = arith.cmpi sge, %22, %23 : vector<1x128xi32>
    %25 = arith.extui %24 : vector<1x128xi1> to vector<1x128xi32>
    %26 = arith.sitofp %25 : vector<1x128xi32> to vector<1x128xf32>
    %c1_i32_8 = arith.constant 1 : i32
    %27 = vector.broadcast %c1_i32_8 : i32 to vector<1x128xi32>
    %28 = arith.cmpi sge, %22, %27 : vector<1x128xi32>
    %29 = arith.extui %28 : vector<1x128xi1> to vector<1x128xi32>
    %30 = arith.sitofp %29 : vector<1x128xi32> to vector<1x128xf32>
    %c63_i32 = arith.constant 63 : i32
    %31 = vector.broadcast %c63_i32 : i32 to vector<1x128xi32>
    %32 = arith.cmpi slt, %22, %31 : vector<1x128xi32>
    %33 = arith.extui %32 : vector<1x128xi1> to vector<1x128xi32>
    %34 = arith.sitofp %33 : vector<1x128xi32> to vector<1x128xf32>
    %c62_i32 = arith.constant 62 : i32
    %35 = vector.broadcast %c62_i32 : i32 to vector<1x128xi32>
    %36 = arith.cmpi slt, %22, %35 : vector<1x128xi32>
    %37 = arith.extui %36 : vector<1x128xi1> to vector<1x128xi32>
    %38 = arith.sitofp %37 : vector<1x128xi32> to vector<1x128xf32>
    %c0_9 = arith.constant 0 : index
    %c0_10 = arith.constant 0 : index
    %c0_11 = arith.constant 0 : index
    %c0_12 = arith.constant 0 : index
    %39 = vector.load %arg6[%c0_9, %c0_10, %c0_11, %c0_12] : memref<2x2x32x1xf32, #tpu.memory_space<vmem>>, vector<1x1x32x1xf32>
    %40 = vector.shape_cast %39 : vector<1x1x32x1xf32> to vector<32x1xf32>
    %c0_13 = arith.constant 0 : index
    %c0_14 = arith.constant 0 : index
    %c0_15 = arith.constant 0 : index
    %c0_16 = arith.constant 0 : index
    %41 = vector.load %arg7[%c0_13, %c0_14, %c0_15, %c0_16] : memref<2x2x32x1xf32, #tpu.memory_space<vmem>>, vector<1x1x32x1xf32>
    %42 = vector.shape_cast %41 : vector<1x1x32x1xf32> to vector<32x1xf32>
    %c0_17 = arith.constant 0 : index
    %c0_18 = arith.constant 0 : index
    %c0_19 = arith.constant 0 : index
    %c0_20 = arith.constant 0 : index
    %43 = vector.load %arg4[%c0_17, %c0_18, %c0_19, %c0_20] : memref<2x2x32x160xf32, #tpu.memory_space<vmem>>, vector<1x1x32x160xf32>
    %44 = vector.shape_cast %43 : vector<1x1x32x160xf32> to vector<32x160xf32>
    %c0_21 = arith.constant 0 : index
    %c0_22 = arith.constant 0 : index
    %c0_23 = arith.constant 0 : index
    %c0_24 = arith.constant 0 : index
    %45 = vector.load %arg5[%c0_21, %c0_22, %c0_23, %c0_24] : memref<2x2x32x1xf32, #tpu.memory_space<vmem>>, vector<1x1x32x1xf32>
    %46 = vector.shape_cast %45 : vector<1x1x32x1xf32> to vector<32x1xf32>
    %47 = vector.broadcast %40 : vector<32x1xf32> to vector<32x128xf32>
    %48 = arith.mulf %5, %47 : vector<32x128xf32>
    %49 = vector.broadcast %42 : vector<32x1xf32> to vector<32x128xf32>
    %50 = arith.addf %48, %49 : vector<32x128xf32>
    %cst_25 = arith.constant 0.000000e+00 : f32
    %51 = vector.broadcast %cst_25 : f32 to vector<32x128xf32>
    %52 = arith.maximumf %50, %51 : vector<32x128xf32>
    %c2_i32_26 = arith.constant 2 : i32
    %53 = tpu.dynamic_rotate %52 by %c2_i32_26 dim 1 : vector<32x128xf32>, i32 -> vector<32x128xf32>
    %54 = vector.broadcast %26 : vector<1x128xf32> to vector<32x128xf32>
    %55 = arith.mulf %53, %54 : vector<32x128xf32>
    %c1_i32_27 = arith.constant 1 : i32
    %56 = tpu.dynamic_rotate %52 by %c1_i32_27 dim 1 : vector<32x128xf32>, i32 -> vector<32x128xf32>
    %57 = vector.broadcast %30 : vector<1x128xf32> to vector<32x128xf32>
    %58 = arith.mulf %56, %57 : vector<32x128xf32>
    %c127_i32 = arith.constant 127 : i32
    %59 = tpu.dynamic_rotate %52 by %c127_i32 dim 1 : vector<32x128xf32>, i32 -> vector<32x128xf32>
    %60 = vector.broadcast %34 : vector<1x128xf32> to vector<32x128xf32>
    %61 = arith.mulf %59, %60 : vector<32x128xf32>
    %c126_i32 = arith.constant 126 : i32
    %62 = tpu.dynamic_rotate %52 by %c126_i32 dim 1 : vector<32x128xf32>, i32 -> vector<32x128xf32>
    %63 = vector.broadcast %38 : vector<1x128xf32> to vector<32x128xf32>
    %64 = arith.mulf %62, %63 : vector<32x128xf32>
    %65 = tpu.concatenate %55, %58, %52, %61, %64 in 0 : vector<32x128xf32>, vector<32x128xf32>, vector<32x128xf32>, vector<32x128xf32>, vector<32x128xf32> -> vector<160x128xf32>
    %cst_28 = arith.constant dense<0.000000e+00> : vector<32x128xf32>
    %66 = tpu.matmul %44, %65, %cst_28 {dimension_numbers = #tpu.dot_dimension_numbers<[1], [0], [0], [1], [0, 0, 1, 1], [], []>} : vector<32x160xf32>, vector<160x128xf32>, vector<32x128xf32> -> vector<32x128xf32>
    %67 = vector.broadcast %46 : vector<32x1xf32> to vector<32x128xf32>
    %68 = arith.addf %66, %67 : vector<32x128xf32>
    %c0_29 = arith.constant 0 : index
    %c1 = arith.constant 1 : index
    %c0_30 = arith.constant 0 : index
    %c0_31 = arith.constant 0 : index
    %69 = vector.load %arg6[%c0_29, %c1, %c0_30, %c0_31] : memref<2x2x32x1xf32, #tpu.memory_space<vmem>>, vector<1x1x32x1xf32>
    %70 = vector.shape_cast %69 : vector<1x1x32x1xf32> to vector<32x1xf32>
    %c0_32 = arith.constant 0 : index
    %c1_33 = arith.constant 1 : index
    %c0_34 = arith.constant 0 : index
    %c0_35 = arith.constant 0 : index
    %71 = vector.load %arg7[%c0_32, %c1_33, %c0_34, %c0_35] : memref<2x2x32x1xf32, #tpu.memory_space<vmem>>, vector<1x1x32x1xf32>
    %72 = vector.shape_cast %71 : vector<1x1x32x1xf32> to vector<32x1xf32>
    %c0_36 = arith.constant 0 : index
    %c1_37 = arith.constant 1 : index
    %c0_38 = arith.constant 0 : index
    %c0_39 = arith.constant 0 : index
    %73 = vector.load %arg4[%c0_36, %c1_37, %c0_38, %c0_39] : memref<2x2x32x160xf32, #tpu.memory_space<vmem>>, vector<1x1x32x160xf32>
    %74 = vector.shape_cast %73 : vector<1x1x32x160xf32> to vector<32x160xf32>
    %c0_40 = arith.constant 0 : index
    %c1_41 = arith.constant 1 : index
    %c0_42 = arith.constant 0 : index
    %c0_43 = arith.constant 0 : index
    %75 = vector.load %arg5[%c0_40, %c1_41, %c0_42, %c0_43] : memref<2x2x32x1xf32, #tpu.memory_space<vmem>>, vector<1x1x32x1xf32>
    %76 = vector.shape_cast %75 : vector<1x1x32x1xf32> to vector<32x1xf32>
    %77 = vector.broadcast %70 : vector<32x1xf32> to vector<32x128xf32>
    %78 = arith.mulf %68, %77 : vector<32x128xf32>
    %79 = vector.broadcast %72 : vector<32x1xf32> to vector<32x128xf32>
    %80 = arith.addf %78, %79 : vector<32x128xf32>
    %cst_44 = arith.constant 0.000000e+00 : f32
    %81 = vector.broadcast %cst_44 : f32 to vector<32x128xf32>
    %82 = arith.maximumf %80, %81 : vector<32x128xf32>
    %c2_i32_45 = arith.constant 2 : i32
    %83 = tpu.dynamic_rotate %82 by %c2_i32_45 dim 1 : vector<32x128xf32>, i32 -> vector<32x128xf32>
    %84 = vector.broadcast %26 : vector<1x128xf32> to vector<32x128xf32>
    %85 = arith.mulf %83, %84 : vector<32x128xf32>
    %c1_i32_46 = arith.constant 1 : i32
    %86 = tpu.dynamic_rotate %82 by %c1_i32_46 dim 1 : vector<32x128xf32>, i32 -> vector<32x128xf32>
    %87 = vector.broadcast %30 : vector<1x128xf32> to vector<32x128xf32>
    %88 = arith.mulf %86, %87 : vector<32x128xf32>
    %c127_i32_47 = arith.constant 127 : i32
    %89 = tpu.dynamic_rotate %82 by %c127_i32_47 dim 1 : vector<32x128xf32>, i32 -> vector<32x128xf32>
    %90 = vector.broadcast %34 : vector<1x128xf32> to vector<32x128xf32>
    %91 = arith.mulf %89, %90 : vector<32x128xf32>
    %c126_i32_48 = arith.constant 126 : i32
    %92 = tpu.dynamic_rotate %82 by %c126_i32_48 dim 1 : vector<32x128xf32>, i32 -> vector<32x128xf32>
    %93 = vector.broadcast %38 : vector<1x128xf32> to vector<32x128xf32>
    %94 = arith.mulf %92, %93 : vector<32x128xf32>
    %95 = tpu.concatenate %85, %88, %82, %91, %94 in 0 : vector<32x128xf32>, vector<32x128xf32>, vector<32x128xf32>, vector<32x128xf32>, vector<32x128xf32> -> vector<160x128xf32>
    %cst_49 = arith.constant dense<0.000000e+00> : vector<32x128xf32>
    %96 = tpu.matmul %74, %95, %cst_49 {dimension_numbers = #tpu.dot_dimension_numbers<[1], [0], [0], [1], [0, 0, 1, 1], [], []>} : vector<32x160xf32>, vector<160x128xf32>, vector<32x128xf32> -> vector<32x128xf32>
    %97 = vector.broadcast %76 : vector<32x1xf32> to vector<32x128xf32>
    %98 = arith.addf %96, %97 : vector<32x128xf32>
    %99 = arith.addf %5, %98 : vector<32x128xf32>
    %c1_50 = arith.constant 1 : index
    %c0_51 = arith.constant 0 : index
    %c0_52 = arith.constant 0 : index
    %c0_53 = arith.constant 0 : index
    %100 = vector.load %arg6[%c1_50, %c0_51, %c0_52, %c0_53] : memref<2x2x32x1xf32, #tpu.memory_space<vmem>>, vector<1x1x32x1xf32>
    %101 = vector.shape_cast %100 : vector<1x1x32x1xf32> to vector<32x1xf32>
    %c1_54 = arith.constant 1 : index
    %c0_55 = arith.constant 0 : index
    %c0_56 = arith.constant 0 : index
    %c0_57 = arith.constant 0 : index
    %102 = vector.load %arg7[%c1_54, %c0_55, %c0_56, %c0_57] : memref<2x2x32x1xf32, #tpu.memory_space<vmem>>, vector<1x1x32x1xf32>
    %103 = vector.shape_cast %102 : vector<1x1x32x1xf32> to vector<32x1xf32>
    %c1_58 = arith.constant 1 : index
    %c0_59 = arith.constant 0 : index
    %c0_60 = arith.constant 0 : index
    %c0_61 = arith.constant 0 : index
    %104 = vector.load %arg4[%c1_58, %c0_59, %c0_60, %c0_61] : memref<2x2x32x160xf32, #tpu.memory_space<vmem>>, vector<1x1x32x160xf32>
    %105 = vector.shape_cast %104 : vector<1x1x32x160xf32> to vector<32x160xf32>
    %c1_62 = arith.constant 1 : index
    %c0_63 = arith.constant 0 : index
    %c0_64 = arith.constant 0 : index
    %c0_65 = arith.constant 0 : index
    %106 = vector.load %arg5[%c1_62, %c0_63, %c0_64, %c0_65] : memref<2x2x32x1xf32, #tpu.memory_space<vmem>>, vector<1x1x32x1xf32>
    %107 = vector.shape_cast %106 : vector<1x1x32x1xf32> to vector<32x1xf32>
    %108 = vector.broadcast %101 : vector<32x1xf32> to vector<32x128xf32>
    %109 = arith.mulf %99, %108 : vector<32x128xf32>
    %110 = vector.broadcast %103 : vector<32x1xf32> to vector<32x128xf32>
    %111 = arith.addf %109, %110 : vector<32x128xf32>
    %cst_66 = arith.constant 0.000000e+00 : f32
    %112 = vector.broadcast %cst_66 : f32 to vector<32x128xf32>
    %113 = arith.maximumf %111, %112 : vector<32x128xf32>
    %c2_i32_67 = arith.constant 2 : i32
    %114 = tpu.dynamic_rotate %113 by %c2_i32_67 dim 1 : vector<32x128xf32>, i32 -> vector<32x128xf32>
    %115 = vector.broadcast %26 : vector<1x128xf32> to vector<32x128xf32>
    %116 = arith.mulf %114, %115 : vector<32x128xf32>
    %c1_i32_68 = arith.constant 1 : i32
    %117 = tpu.dynamic_rotate %113 by %c1_i32_68 dim 1 : vector<32x128xf32>, i32 -> vector<32x128xf32>
    %118 = vector.broadcast %30 : vector<1x128xf32> to vector<32x128xf32>
    %119 = arith.mulf %117, %118 : vector<32x128xf32>
    %c127_i32_69 = arith.constant 127 : i32
    %120 = tpu.dynamic_rotate %113 by %c127_i32_69 dim 1 : vector<32x128xf32>, i32 -> vector<32x128xf32>
    %121 = vector.broadcast %34 : vector<1x128xf32> to vector<32x128xf32>
    %122 = arith.mulf %120, %121 : vector<32x128xf32>
    %c126_i32_70 = arith.constant 126 : i32
    %123 = tpu.dynamic_rotate %113 by %c126_i32_70 dim 1 : vector<32x128xf32>, i32 -> vector<32x128xf32>
    %124 = vector.broadcast %38 : vector<1x128xf32> to vector<32x128xf32>
    %125 = arith.mulf %123, %124 : vector<32x128xf32>
    %126 = tpu.concatenate %116, %119, %113, %122, %125 in 0 : vector<32x128xf32>, vector<32x128xf32>, vector<32x128xf32>, vector<32x128xf32>, vector<32x128xf32> -> vector<160x128xf32>
    %cst_71 = arith.constant dense<0.000000e+00> : vector<32x128xf32>
    %127 = tpu.matmul %105, %126, %cst_71 {dimension_numbers = #tpu.dot_dimension_numbers<[1], [0], [0], [1], [0, 0, 1, 1], [], []>} : vector<32x160xf32>, vector<160x128xf32>, vector<32x128xf32> -> vector<32x128xf32>
    %128 = vector.broadcast %107 : vector<32x1xf32> to vector<32x128xf32>
    %129 = arith.addf %127, %128 : vector<32x128xf32>
    %c1_72 = arith.constant 1 : index
    %c1_73 = arith.constant 1 : index
    %c0_74 = arith.constant 0 : index
    %c0_75 = arith.constant 0 : index
    %130 = vector.load %arg6[%c1_72, %c1_73, %c0_74, %c0_75] : memref<2x2x32x1xf32, #tpu.memory_space<vmem>>, vector<1x1x32x1xf32>
    %131 = vector.shape_cast %130 : vector<1x1x32x1xf32> to vector<32x1xf32>
    %c1_76 = arith.constant 1 : index
    %c1_77 = arith.constant 1 : index
    %c0_78 = arith.constant 0 : index
    %c0_79 = arith.constant 0 : index
    %132 = vector.load %arg7[%c1_76, %c1_77, %c0_78, %c0_79] : memref<2x2x32x1xf32, #tpu.memory_space<vmem>>, vector<1x1x32x1xf32>
    %133 = vector.shape_cast %132 : vector<1x1x32x1xf32> to vector<32x1xf32>
    %c1_80 = arith.constant 1 : index
    %c1_81 = arith.constant 1 : index
    %c0_82 = arith.constant 0 : index
    %c0_83 = arith.constant 0 : index
    %134 = vector.load %arg4[%c1_80, %c1_81, %c0_82, %c0_83] : memref<2x2x32x160xf32, #tpu.memory_space<vmem>>, vector<1x1x32x160xf32>
    %135 = vector.shape_cast %134 : vector<1x1x32x160xf32> to vector<32x160xf32>
    %c1_84 = arith.constant 1 : index
    %c1_85 = arith.constant 1 : index
    %c0_86 = arith.constant 0 : index
    %c0_87 = arith.constant 0 : index
    %136 = vector.load %arg5[%c1_84, %c1_85, %c0_86, %c0_87] : memref<2x2x32x1xf32, #tpu.memory_space<vmem>>, vector<1x1x32x1xf32>
    %137 = vector.shape_cast %136 : vector<1x1x32x1xf32> to vector<32x1xf32>
    %138 = vector.broadcast %131 : vector<32x1xf32> to vector<32x128xf32>
    %139 = arith.mulf %129, %138 : vector<32x128xf32>
    %140 = vector.broadcast %133 : vector<32x1xf32> to vector<32x128xf32>
    %141 = arith.addf %139, %140 : vector<32x128xf32>
    %cst_88 = arith.constant 0.000000e+00 : f32
    %142 = vector.broadcast %cst_88 : f32 to vector<32x128xf32>
    %143 = arith.maximumf %141, %142 : vector<32x128xf32>
    %c2_i32_89 = arith.constant 2 : i32
    %144 = tpu.dynamic_rotate %143 by %c2_i32_89 dim 1 : vector<32x128xf32>, i32 -> vector<32x128xf32>
    %145 = vector.broadcast %26 : vector<1x128xf32> to vector<32x128xf32>
    %146 = arith.mulf %144, %145 : vector<32x128xf32>
    %c1_i32_90 = arith.constant 1 : i32
    %147 = tpu.dynamic_rotate %143 by %c1_i32_90 dim 1 : vector<32x128xf32>, i32 -> vector<32x128xf32>
    %148 = vector.broadcast %30 : vector<1x128xf32> to vector<32x128xf32>
    %149 = arith.mulf %147, %148 : vector<32x128xf32>
    %c127_i32_91 = arith.constant 127 : i32
    %150 = tpu.dynamic_rotate %143 by %c127_i32_91 dim 1 : vector<32x128xf32>, i32 -> vector<32x128xf32>
    %151 = vector.broadcast %34 : vector<1x128xf32> to vector<32x128xf32>
    %152 = arith.mulf %150, %151 : vector<32x128xf32>
    %c126_i32_92 = arith.constant 126 : i32
    %153 = tpu.dynamic_rotate %143 by %c126_i32_92 dim 1 : vector<32x128xf32>, i32 -> vector<32x128xf32>
    %154 = vector.broadcast %38 : vector<1x128xf32> to vector<32x128xf32>
    %155 = arith.mulf %153, %154 : vector<32x128xf32>
    %156 = tpu.concatenate %146, %149, %143, %152, %155 in 0 : vector<32x128xf32>, vector<32x128xf32>, vector<32x128xf32>, vector<32x128xf32>, vector<32x128xf32> -> vector<160x128xf32>
    %cst_93 = arith.constant dense<0.000000e+00> : vector<32x128xf32>
    %157 = tpu.matmul %135, %156, %cst_93 {dimension_numbers = #tpu.dot_dimension_numbers<[1], [0], [0], [1], [0, 0, 1, 1], [], []>} : vector<32x160xf32>, vector<160x128xf32>, vector<32x128xf32> -> vector<32x128xf32>
    %158 = vector.broadcast %137 : vector<32x1xf32> to vector<32x128xf32>
    %159 = arith.addf %157, %158 : vector<32x128xf32>
    %160 = arith.addf %99, %159 : vector<32x128xf32>
    %c0_94 = arith.constant 0 : index
    %c0_95 = arith.constant 0 : index
    %161 = vector.load %arg8[%c0_94, %c0_95] : memref<16x32xf32, #tpu.memory_space<vmem>>, vector<16x32xf32>
    %cst_96 = arith.constant dense<0.000000e+00> : vector<16x128xf32>
    %162 = tpu.matmul %161, %160, %cst_96 {dimension_numbers = #tpu.dot_dimension_numbers<[1], [0], [0], [1], [0, 0, 1, 1], [], []>} : vector<16x32xf32>, vector<32x128xf32>, vector<16x128xf32> -> vector<16x128xf32>
    %c0_97 = arith.constant 0 : index
    %c0_98 = arith.constant 0 : index
    %163 = vector.load %arg9[%c0_97, %c0_98] : memref<16x1xf32, #tpu.memory_space<vmem>>, vector<16x1xf32>
    %164 = vector.broadcast %163 : vector<16x1xf32> to vector<16x128xf32>
    %165 = arith.addf %162, %164 : vector<16x128xf32>
    %166 = arith.negf %165 : vector<16x128xf32>
    %167 = math.exp %166 : vector<16x128xf32>
    %cst_99 = arith.constant 1.000000e+00 : f32
    %168 = vector.broadcast %cst_99 : f32 to vector<16x128xf32>
    %169 = arith.addf %168, %167 : vector<16x128xf32>
    %170 = arith.divf %168, %169 : vector<16x128xf32>
    %171 = arith.mulf %0, %170 : vector<16x128xf32>
    %c0_100 = arith.constant 0 : index
    %c0_101 = arith.constant 0 : index
    %172 = vector.load %arg10[%c0_100, %c0_101] : memref<16x128xf32, #tpu.memory_space<vmem>>, vector<16x128xf32>
    tpu.vector_store %arg10[%c0_100, %c0_101], %171 {strides = array<i32>} : memref<16x128xf32, #tpu.memory_space<vmem>>, vector<16x128xf32>,
    return
  }
  func.func @transform_0(%arg0: i32) -> (i32, i32) {
    %c0_i32 = arith.constant 0 : i32
    %c0_i32_0 = arith.constant 0 : i32
    return %c0_i32, %arg0 : i32, i32
  }
  func.func @transform_1(%arg0: i32) -> (i32, i32) {
    %c0_i32 = arith.constant 0 : i32
    %c0_i32_0 = arith.constant 0 : i32
    %c0_i32_1 = arith.constant 0 : i32
    return %c0_i32, %c0_i32_0 : i32, i32
  }
  func.func @transform_2(%arg0: i32) -> (i32, i32) {
    %c0_i32 = arith.constant 0 : i32
    %c0_i32_0 = arith.constant 0 : i32
    %c0_i32_1 = arith.constant 0 : i32
    return %c0_i32, %c0_i32_0 : i32, i32
  }
  func.func @transform_3(%arg0: i32) -> (i32, i32, i32, i32) {
    %c0_i32 = arith.constant 0 : i32
    %c0_i32_0 = arith.constant 0 : i32
    %c0_i32_1 = arith.constant 0 : i32
    %c0_i32_2 = arith.constant 0 : i32
    %c0_i32_3 = arith.constant 0 : i32
    return %c0_i32, %c0_i32_0, %c0_i32_1, %c0_i32_2 : i32, i32, i32, i32
  }
  func.func @transform_4(%arg0: i32) -> (i32, i32, i32, i32) {
    %c0_i32 = arith.constant 0 : i32
    %c0_i32_0 = arith.constant 0 : i32
    %c0_i32_1 = arith.constant 0 : i32
    %c0_i32_2 = arith.constant 0 : i32
    %c0_i32_3 = arith.constant 0 : i32
    return %c0_i32, %c0_i32_0, %c0_i32_1, %c0_i32_2 : i32, i32, i32, i32
  }
  func.func @transform_5(%arg0: i32) -> (i32, i32, i32, i32) {
    %c0_i32 = arith.constant 0 : i32
    %c0_i32_0 = arith.constant 0 : i32
    %c0_i32_1 = arith.constant 0 : i32
    %c0_i32_2 = arith.constant 0 : i32
    %c0_i32_3 = arith.constant 0 : i32
    return %c0_i32, %c0_i32_0, %c0_i32_1, %c0_i32_2 : i32, i32, i32, i32
  }
  func.func @transform_6(%arg0: i32) -> (i32, i32, i32, i32) {
    %c0_i32 = arith.constant 0 : i32
    %c0_i32_0 = arith.constant 0 : i32
    %c0_i32_1 = arith.constant 0 : i32
    %c0_i32_2 = arith.constant 0 : i32
    %c0_i32_3 = arith.constant 0 : i32
    return %c0_i32, %c0_i32_0, %c0_i32_1, %c0_i32_2 : i32, i32, i32, i32
  }
  func.func @transform_7(%arg0: i32) -> (i32, i32) {
    %c0_i32 = arith.constant 0 : i32
    %c0_i32_0 = arith.constant 0 : i32
    %c0_i32_1 = arith.constant 0 : i32
    return %c0_i32, %c0_i32_0 : i32, i32
  }
  func.func @transform_8(%arg0: i32) -> (i32, i32) {
    %c0_i32 = arith.constant 0 : i32
    %c0_i32_0 = arith.constant 0 : i32
    %c0_i32_1 = arith.constant 0 : i32
    return %c0_i32, %c0_i32_0 : i32, i32
  }
  func.func @transform_9(%arg0: i32) -> (i32, i32) {
    %c0_i32 = arith.constant 0 : i32
    %c0_i32_0 = arith.constant 0 : i32
    return %c0_i32, %arg0 : i32, i32
  }
}

</mosaic_0001>

<bundles_post_ra>
// kernel: tpu_custom_call.1
= control target key start
LH: loop header
LB: loop body
LE: loop exit
PB: predicated region body
PF: predicated region fallthrough
CT: control target
= control target key end

     0   :  { %vm63_vm0 = vcmask 130048   ;;  %v1447_v4 = vmov 0   ;;  %s2141_s0 = inlined_call_operand.vmem [shape: f32[16,128], index: 0, kind: input, shape index: {}]   ;;  %s2142_s1 = inlined_call_operand.vmem [shape: f32[32,16], index: 1, kind: input, shape index: {}]   ;;  %s2143_s2 = inlined_call_operand.vmem [shape: f32[32,1], index: 2, kind: input, shape index: {}]   ;;  %s2144_s3 = inlined_call_operand.vmem [shape: f32[2,2,32,160], index: 3, kind: input, shape index: {}]   ;;  %s2145_s4 = inlined_call_operand.vmem [shape: f32[2,2,32,1], index: 4, kind: input, shape index: {}]   ;;  %s2146_s5 = inlined_call_operand.vmem [shape: f32[2,2,32,1], index: 5, kind: input, shape index: {}]   ;;  %s2147_s6 = inlined_call_operand.vmem [shape: f32[2,2,32,1], index: 6, kind: input, shape index: {}]   ;;  %s2148_s7 = inlined_call_operand.vmem [shape: f32[16,32], index: 7, kind: input, shape index: {}]   ;;  %s2149_s8 = inlined_call_operand.vmem [shape: f32[16,1], index: 8, kind: input, shape index: {}]   ;;  %s2150_s9 = inlined_call_operand.hbm [shape: f32[16,128], index: 9, kind: output, shape index: {}]  }
   0x1   :  { %v34_v0 = vld [vmem:[%s2141_s0 + $0x8] sm:$0xff]  ;;  %v33_v1 = vld [vmem:[%s2141_s0] sm:$0xff]  ;;  %1413 = vset.pattern.permute.xlu0 %v1447_v4  ;;  %v42_v5 = vld [vmem:[%s2143_s2 + $0x18] sm:$0xff]  ;;  %1414 = vset.pattern.permute.xlu1 %v1447_v4 }
   0x2   :  { %v35_v2 = vld [vmem:[%s2142_s1] sm:$0xff]  ;;  %1383 = vmatprep.subr.mxu0 %v34_v0  ;;  %v36_v3 = vld [vmem:[%s2142_s1 + $0x8] sm:$0xff]  ;;  %v190_v6 = vld [vmem:[%s2146_s5 + $0x18] sm:$0xff]  ;;  %60 = vperm.xlu0 %1413, %v42_v5  }
   0x3   :  { %1387 = vmatprep.mubr.msk.f32.mxu0 %vm63_vm0, %v35_v2  ;;  %1384 = vmatpush3.msra.mxu0 %v34_v0  ;;  %v37_v7 = vld [vmem:[%s2142_s1 + $0x10] sm:$0xff]  ;;  %v38_v9 = vld [vmem:[%s2142_s1 + $0x18] sm:$0xff]  ;;  %v40_v10 = vld [vmem:[%s2143_s2 + $0x8] sm:$0xff] }
   0x4   :  { %1385 = vmatprep.subr.mxu0 %v33_v1  ;;  %v41_v8 = vld [vmem:[%s2143_s2 + $0x10] sm:$0xff]  ;;  %224 = vperm.xlu1 %1414, %v190_v6  }
   0x5   :  { %1386 = vmatpush3.msra.mxu0 %v33_v1 }
   0x6   :  { %1388 = vmatmul.mubr.msk.f32.vlgmr.msra.gmra.mxu0 %vm63_vm0, %v36_v3 }
   0x7   :  { %1390 = vmatprep.mubr.msk.f32.mxu0 %vm63_vm0, %v37_v7 }
   0x8   :  { %14 = vsyncpa [#allocation3], 0  ;;  %55 = vperm.xlu0 %1413, %v41_v8   ;;  %v189_v11 = vld [vmem:[%s2146_s5 + $0x10] sm:$0xff]  ;;  %50 = vperm.xlu1 %1414, %v40_v10   ;;  %v194_v12 = vld [vmem:[%s2147_s6 + $0x18] sm:$0xff]  ;;  %v1448_v26 = vmov 0.0   ;;  %s1449_s22 = smov 127   ;;  %v161_v1 = vlaneseq }
   0x9   :  { %v39_v13 = vld [vmem:[%s2143_s2] sm:$0xff]  ;;  %v188_v14 = vld [vmem:[%s2146_s5 + $0x8] sm:$0xff]  ;;  %v193_v15 = vld [vmem:[%s2147_s6 + $0x10] sm:$0xff]  ;;  %340 = vmatprep.subr.mxu1 %v1448_v26  ;;  %581 = vmatprep.subr.mxu0 %v1448_v26  ;;  %s1450_s23 = smov 1   ;;  %s1451_s24 = smov 2   ;;  %vm327_vm1 = vcmask 261120  }
   0xa   :  { %1391 = vmatmul.mubr.msk.f32.gmra.mxu0 %vm63_vm0, %v38_v9  ;;  %v187_v16 = vld [vmem:[%s2146_s5] sm:$0xff]  ;;  %v192_v17 = vld [vmem:[%s2147_s6 + $0x8] sm:$0xff]  ;;  %s1452_s25 = smov 126   ;;  %v206_v53 = vld [vmem:[%s2145_s4 + $0x18] sm:$0xff]  ;;  %v162_v2 = vand.u32 127, %v161_v1 }
   0xb   :  { %v191_v18 = vld [vmem:[%s2147_s6] sm:$0xff]  ;;  %v196_v52 = vld [vmem:[%s2144_s3 + $0x8] sm:$0xff]  ;;  %v205_v54 = vld [vmem:[%s2145_s4 + $0x10] sm:$0xff] }
   0xc   :  { %219 = vperm.xlu0 %1413, %v189_v11   ;;  %248 = vperm.xlu1 %1414, %v194_v12   ;;  %v1298_v55 = vld [vmem:[%s2146_s5 + $0x38] sm:$0xff]  ;;  %v204_v56 = vld [vmem:[%s2145_s4 + $0x8] sm:$0xff]  ;;  %v1297_v57 = vld [vmem:[%s2146_s5 + $0x30] sm:$0xff]  ;;  %v167_v3 = vand.u32 63, %v162_v2 }
   0xd   :  { %1291 = vmatprep.mubr.msk.f32.mxu1 %vm327_vm1, %v196_v52  ;;  %v1302_v58 = vld [vmem:[%s2147_s6 + $0x38] sm:$0xff]  ;;  %v203_v59 = vld [vmem:[%s2145_s4] sm:$0xff]  ;;  %v1296_v60 = vld [vmem:[%s2146_s5 + $0x28] sm:$0xff] }
   0xe   :  { %v1301_v61 = vld [vmem:[%s2147_s6 + $0x30] sm:$0xff]  ;;  %v1295_v62 = vld [vmem:[%s2146_s5 + $0x20] sm:$0xff]  ;;  %v1300_v63 = vld [vmem:[%s2147_s6 + $0x28] sm:$0xff]  ;;  %vm181_vm2 = vcmp.lt.s32.totalorder %v167_v3, 63  ;;  %vm178_vm3 = vcmp.ge.s32.totalorder %v167_v3, 1  ;;  %vm175_vm4 = vcmp.ge.s32.totalorder %v167_v3, 2 }
   0xf   :  { %v1299_v0 = vld [vmem:[%s2147_s6 + $0x20] sm:$0xff]  ;;  %v1659_v4 = vsel %vm181_vm2, 1.0, %v1448_v26  ;;  %vm184_vm5 = vcmp.lt.s32.totalorder %v167_v3, 62 }
  0x10   :  { %45 = vperm.xlu0 %1413, %v39_v13   ;;  %214 = vperm.xlu1 %1414, %v188_v14  }
  0x14   :  { %243 = vperm.xlu0 %1413, %v193_v15   ;;  %209 = vperm.xlu1 %1414, %v187_v16   ;;  %v1673_v16 = vsel %vm178_vm3, 1.0, %v1448_v26 }
  0x18   :  { %238 = vperm.xlu0 %1413, %v192_v17   ;;  %233 = vperm.xlu1 %1414, %v191_v18  }
  0x7d   :  { %v61_v19 = vpop.permute.xlu0 %60 }
  0x7f   :  { %v225_v20 = vpop.permute.xlu1 %224 }
  0x83   :  { %v56_v21 = vpop.permute.xlu0 %55  ;;  %v51_v22 = vpop.permute.xlu1 %50 }
  0x87   :  { %v220_v23 = vpop.permute.xlu0 %219  ;;  %v249_v24 = vpop.permute.xlu1 %248 }
  0x8b   :  { %v46_v25 = vpop.permute.xlu0 %45  ;;  %v215_v27 = vpop.permute.xlu1 %214 }
  0x8f   :  { %v244_v31 = vpop.permute.xlu0 %243  ;;  %v210_v35 = vpop.permute.xlu1 %209 }
  0x93   :  { %v239_v43 = vpop.permute.xlu0 %238  ;;  %v234_v47 = vpop.permute.xlu1 %233 }
  0xc6   :  { %v1389_v28 = vpop.f32.mrf.mxu0 }
  0xc7   :  { %v1566_v30 = vadd.f32 %v1389_v28, %v51_v22 }
  0xc8   :  { %v142_v29 = vpop.f32.mrf.mxu0 }
  0xc9   :  { %v1568_v33 = vadd.f32 %v142_v29, %v46_v25  ;;  %v228_v37 = vmul.f32 %v215_v27, %v1566_v30 }
  0xca   :  { %v1392_v32 = vpop.f32.mrf.mxu0 }
  0xcb   :  { %v1570_v34 = vadd.f32 %v1392_v32, %v61_v19  ;;  %v227_v40 = vmul.f32 %v210_v35, %v1568_v33  ;;  %v252_v44 = vadd.f32 %v239_v43, %v228_v37  ;;  %v1696_v35 = vsel %vm184_vm5, 1.0, %v1448_v26 }
  0xcc   :  { %v152_v36 = vpop.f32.mrf.mxu0 }
  0xcd   :  { %v230_v38 = vmul.f32 %v225_v20, %v1570_v34  ;;  %v1574_v39 = vadd.f32 %v152_v36, %v56_v21  ;;  %v251_v48 = vadd.f32 %v234_v47, %v227_v40  ;;  %v1584_v50 = vmax.f32 %v252_v44, 0.0  ;;  %v197_v47 = vld [vmem:[%s2144_s3 + $0x10] sm:$0xff] }
  0xcf   :  { %v254_v41 = vadd.f32 %v249_v24, %v230_v38  ;;  %v229_v42 = vmul.f32 %v220_v23, %v1574_v39  ;;  %v1588_v51 = vmax.f32 %v251_v48, 0.0  ;;  %v1685_v23 = vsel %vm175_vm4, 1.0, %v1448_v26  ;;  %v200_v48 = vld [vmem:[%s2144_s3 + $0x28] sm:$0xff] }
  0xd1   :  { %v1578_v45 = vmax.f32 %v254_v41, 0.0  ;;  %v253_v46 = vadd.f32 %v244_v31, %v229_v42 }
  0xd3   :  { %v1580_v49 = vmax.f32 %v253_v46, 0.0  ;;  %289 = vrot.lane.b32.xlu0 %v1578_v45, %s1449_s22  ;;  %v198_v46 = vld [vmem:[%s2144_s3 + $0x18] sm:$0xff] }
  0xd5   :  { %287 = vrot.lane.b32.xlu1 %v1580_v49, %s1449_s22 }
  0xd7   :  { %285 = vrot.lane.b32.xlu0 %v1584_v50, %s1449_s22 }
  0xd9   :  { %283 = vrot.lane.b32.xlu1 %v1588_v51, %s1449_s22 }
  0xdb   :  { %277 = vrot.lane.b32.xlu0 %v1578_v45, %s1450_s23 }
  0xdd   :  { %275 = vrot.lane.b32.xlu1 %v1580_v49, %s1450_s23 }
  0xdf   :  { %273 = vrot.lane.b32.xlu0 %v1584_v50, %s1450_s23 }
  0xe1   :  { %271 = vrot.lane.b32.xlu1 %v1588_v51, %s1450_s23 }
  0xe3   :  { %265 = vrot.lane.b32.xlu0 %v1578_v45, %s1451_s24 }
  0xe5   :  { %263 = vrot.lane.b32.xlu1 %v1580_v49, %s1451_s24 }
  0xe7   :  { %261 = vrot.lane.b32.xlu0 %v1584_v50, %s1451_s24 }
  0xe9   :  { %259 = vrot.lane.b32.xlu1 %v1588_v51, %s1451_s24 }
  0xeb   :  { %301 = vrot.lane.b32.xlu0 %v1578_v45, %s1452_s25 }
  0xed   :  { %299 = vrot.lane.b32.xlu1 %v1580_v49, %s1452_s25 }
  0xef   :  { %297 = vrot.lane.b32.xlu0 %v1584_v50, %s1452_s25 }
  0xf1   :  { %295 = vrot.lane.b32.xlu1 %v1588_v51, %s1452_s25 }
  0xf3   :  { %324 = vperm.xlu0 %1413, %v206_v53  }
  0xf5   :  { %319 = vperm.xlu1 %1414, %v205_v54  }
  0xf7   :  { %466 = vperm.xlu0 %1413, %v1298_v55  }
  0xf9   :  { %314 = vperm.xlu1 %1414, %v204_v56  }
  0xfb   :  { %461 = vperm.xlu0 %1413, %v1297_v57  }
  0xfd   :  { %490 = vperm.xlu1 %1414, %v1302_v58  }
  0xff   :  { %309 = vperm.xlu0 %1413, %v203_v59  }
 0x101   :  { %456 = vperm.xlu1 %1414, %v1296_v60  }
 0x103   :  { %485 = vperm.xlu0 %1413, %v1301_v61  }
 0x105   :  { %451 = vperm.xlu1 %1414, %v1295_v62  }
 0x107   :  { %480 = vperm.xlu0 %1413, %v1300_v63  }
 0x109   :  { %475 = vperm.xlu1 %1414, %v1299_v0  }
 0x145   :  { %v290_v5 = vpop.permute.xlu0 %289 }
 0x146   :  { %v294_v6 = vmul.f32 %v1659_v4, %v290_v5 }
 0x147   :  { %v288_v7 = vpop.permute.xlu1 %287 }
 0x148   :  { %v293_v8 = vmul.f32 %v1659_v4, %v288_v7  ;;  %341 = vmatpush1.msra.mxu1 %v294_v6 }
 0x149   :  { %342 = vmatprep.subr.mxu1 %v1448_v26  ;;  %v286_v9 = vpop.permute.xlu0 %285 }
 0x14a   :  { %v292_v10 = vmul.f32 %v1659_v4, %v286_v9  ;;  %343 = vmatpush1.msra.mxu1 %v293_v8 }
 0x14b   :  { %344 = vmatprep.subr.mxu1 %v1448_v26  ;;  %v284_v11 = vpop.permute.xlu1 %283 }
 0x14c   :  { %v291_v12 = vmul.f32 %v1659_v4, %v284_v11  ;;  %345 = vmatpush1.msra.mxu1 %v292_v10 }
 0x14d   :  { %v278_v13 = vpop.permute.xlu0 %277  ;;  %346 = vmatprep.subr.mxu1 %v1448_v26 }
 0x14e   :  { %347 = vmatpush1.msra.mxu1 %v291_v12  ;;  %v282_v19 = vmul.f32 %v1673_v16, %v278_v13 }
 0x14f   :  { %348 = vmatprep.subr.mxu1 %v1448_v26  ;;  %v276_v14 = vpop.permute.xlu1 %275 }
 0x150   :  { %349 = vmatpush1.msra.mxu1 %v1578_v45  ;;  %v281_v21 = vmul.f32 %v1673_v16, %v276_v14  ;;  %v195_v45 = vld [vmem:[%s2144_s3] sm:$0xff] }
 0x151   :  { %v274_v15 = vpop.permute.xlu0 %273  ;;  %350 = vmatprep.subr.mxu1 %v1448_v26 }
 0x152   :  { %351 = vmatpush1.msra.mxu1 %v1580_v49  ;;  %v280_v22 = vmul.f32 %v1673_v16, %v274_v15  ;;  %v199_v49 = vld [vmem:[%s2144_s3 + $0x20] sm:$0xff] }
 0x153   :  { %352 = vmatprep.subr.mxu1 %v1448_v26  ;;  %v272_v17 = vpop.permute.xlu1 %271 }
 0x154   :  { %353 = vmatpush1.msra.mxu1 %v1584_v50  ;;  %v279_v25 = vmul.f32 %v1673_v16, %v272_v17  ;;  %v202_v50 = vld [vmem:[%s2144_s3 + $0x38] sm:$0xff] }
 0x155   :  { %v266_v18 = vpop.permute.xlu0 %265  ;;  %354 = vmatprep.subr.mxu1 %v1448_v26 }
 0x156   :  { %355 = vmatpush1.msra.mxu1 %v1588_v51  ;;  %v270_v28 = vmul.f32 %v1685_v23, %v266_v18  ;;  %v201_v51 = vld [vmem:[%s2144_s3 + $0x30] sm:$0xff] }
 0x157   :  { %356 = vmatprep.subr.mxu1 %v1448_v26  ;;  %v264_v20 = vpop.permute.xlu1 %263 }
 0x158   :  { %357 = vmatpush1.msra.mxu1 %v282_v19  ;;  %v269_v29 = vmul.f32 %v1685_v23, %v264_v20 }
 0x159   :  { %358 = vmatprep.subr.mxu1 %v1448_v26  ;;  %v262_v24 = vpop.permute.xlu0 %261 }
 0x15a   :  { %359 = vmatpush1.msra.mxu1 %v281_v21  ;;  %v268_v32 = vmul.f32 %v1685_v23, %v262_v24 }
 0x15b   :  { %360 = vmatprep.subr.mxu1 %v1448_v26  ;;  %v260_v27 = vpop.permute.xlu1 %259 }
 0x15c   :  { %361 = vmatpush1.msra.mxu1 %v280_v22  ;;  %v267_v37 = vmul.f32 %v1685_v23, %v260_v27 }
 0x15d   :  { %362 = vmatprep.subr.mxu1 %v1448_v26  ;;  %v302_v31 = vpop.permute.xlu0 %301 }
 0x15e   :  { %363 = vmatpush1.msra.mxu1 %v279_v25  ;;  %v306_v38 = vmul.f32 %v1696_v35, %v302_v31  ;;  %v1314_v31 = vld [vmem:[%s2145_s4 + $0x38] sm:$0xff] }
 0x15f   :  { %364 = vmatprep.subr.mxu1 %v1448_v26  ;;  %v300_v36 = vpop.permute.xlu1 %299 }
 0x160   :  { %365 = vmatpush1.msra.mxu1 %v270_v28  ;;  %v305_v41 = vmul.f32 %v1696_v35, %v300_v36  ;;  %v1313_v28 = vld [vmem:[%s2145_s4 + $0x30] sm:$0xff]  ;;  %v1312_v36 = vld [vmem:[%s2145_s4 + $0x28] sm:$0xff] }
 0x161   :  { %366 = vmatprep.subr.mxu1 %v1448_v26  ;;  %v298_v40 = vpop.permute.xlu0 %297 }
 0x162   :  { %367 = vmatpush1.msra.mxu1 %v269_v29  ;;  %v304_v43 = vmul.f32 %v1696_v35, %v298_v40  ;;  %v1304_v29 = vld [vmem:[%s2144_s3 + $0x48] sm:$0xff] }
 0x163   :  { %368 = vmatprep.subr.mxu1 %v1448_v26  ;;  %v296_v42 = vpop.permute.xlu1 %295  ;;  %1315 = vmatprep.mubr.msk.f32.mxu0 %vm327_vm1, %v1304_v29  ;;  %v1320_v40 = vld [vmem:[%s2146_s5 + $0x48] sm:$0xff] }
 0x164   :  { %369 = vmatpush1.msra.mxu1 %v268_v32  ;;  %v303_v44 = vmul.f32 %v1696_v35, %v296_v42  ;;  %v1322_v32 = vld [vmem:[%s2146_s5 + $0x58] sm:$0xff]  ;;  %v1319_v42 = vld [vmem:[%s2146_s5 + $0x40] sm:$0xff] }
 0x165   :  { %370 = vmatprep.subr.mxu1 %v1448_v26 }
 0x166   :  { %371 = vmatpush1.msra.mxu1 %v267_v37  ;;  %v1321_v37 = vld [vmem:[%s2146_s5 + $0x50] sm:$0xff] }
 0x167   :  { %396 = vmatprep.subr.mxu1 %v1448_v26 }
 0x168   :  { %397 = vmatpush2.msra.mxu1 %v306_v38  ;;  %v1311_v38 = vld [vmem:[%s2145_s4 + $0x20] sm:$0xff] }
 0x169   :  { %398 = vmatprep.subr.mxu1 %v1448_v26 }
 0x16a   :  { %399 = vmatpush2.msra.mxu1 %v305_v41  ;;  %v1326_v41 = vld [vmem:[%s2147_s6 + $0x58] sm:$0xff] }
 0x16b   :  { %400 = vmatprep.subr.mxu1 %v1448_v26 }
 0x16c   :  { %401 = vmatpush2.msra.mxu1 %v304_v43  ;;  %v1325_v43 = vld [vmem:[%s2147_s6 + $0x50] sm:$0xff] }
 0x16d   :  { %402 = vmatprep.subr.mxu1 %v1448_v26 }
 0x16e   :  { %403 = vmatpush2.msra.mxu1 %v303_v44  ;;  %v325_v53 = vpop.permute.xlu0 %324  ;;  %v1323_v44 = vld [vmem:[%s2147_s6 + $0x40] sm:$0xff] }
 0x16f   :  { %405 = vmatmul.mubr.f32.vlgmr.msra.gmra.mxu1 %v195_v45  ;;  %826 = vmatprep.subr.mxu1 %v1448_v26  ;;  %v1324_v45 = vld [vmem:[%s2147_s6 + $0x48] sm:$0xff] }
 0x170   :  { %1292 = vmatprep.mubr.msk.f32.mxu1 %vm327_vm1, %v198_v46  ;;  %v320_v52 = vpop.permute.xlu1 %319 }
 0x172   :  { %v467_v55 = vpop.permute.xlu0 %466 }
 0x173   :  { %410 = vmatmul.mubr.f32.gmra.mxu1 %v197_v47 }
 0x174   :  { %1293 = vmatprep.mubr.msk.f32.mxu1 %vm327_vm1, %v200_v48  ;;  %v315_v54 = vpop.permute.xlu1 %314 }
 0x176   :  { %v462_v57 = vpop.permute.xlu0 %461 }
 0x177   :  { %415 = vmatmul.mubr.f32.gmra.mxu1 %v199_v49 }
 0x178   :  { %1294 = vmatprep.mubr.msk.f32.mxu1 %vm327_vm1, %v202_v50  ;;  %v491_v56 = vpop.permute.xlu1 %490 }
 0x17a   :  { %v310_v62 = vpop.permute.xlu0 %309 }
 0x17b   :  { %420 = vmatmul.mubr.f32.gmra.mxu1 %v201_v51 }
 0x17c   :  { %v457_v59 = vpop.permute.xlu1 %456 }
 0x17e   :  { %v486_v9 = vpop.permute.xlu0 %485 }
 0x180   :  { %v452_v1 = vpop.permute.xlu1 %451 }
 0x182   :  { %v481_v21 = vpop.permute.xlu0 %480 }
 0x184   :  { %v476_v13 = vpop.permute.xlu1 %475 }
 0x22f   :  { %v406_v58 = vpop.f32.mrf.mxu1 }
 0x230   :  { %v407_v0 = vadd.f32 %v406_v58, %v310_v62 }
 0x231   :  { %v408_v60 = vpop.f32.mrf.mxu1 }
 0x232   :  { %v469_v6 = vmul.f32 %v452_v1, %v407_v0 }
 0x233   :  { %v411_v61 = vpop.f32.mrf.mxu1 }
 0x234   :  { %v412_v7 = vadd.f32 %v411_v61, %v315_v54  ;;  %v493_v15 = vadd.f32 %v476_v13, %v469_v6 }
 0x235   :  { %v413_v63 = vpop.f32.mrf.mxu1 }
 0x236   :  { %v470_v17 = vmul.f32 %v457_v59, %v412_v7  ;;  %v1738_v22 = vmax.f32 %v493_v15, 0.0  ;;  %v1303_v15 = vld [vmem:[%s2144_s3 + $0x40] sm:$0xff] }
 0x237   :  { %v416_v2 = vpop.f32.mrf.mxu1 }
 0x238   :  { %v417_v3 = vadd.f32 %v416_v2, %v320_v52  ;;  %v494_v24 = vadd.f32 %v481_v21, %v470_v17  ;;  %v1306_v17 = vld [vmem:[%s2144_s3 + $0x58] sm:$0xff] }
 0x239   :  { %v418_v5 = vpop.f32.mrf.mxu1  ;;  %v1310_v21 = vld [vmem:[%s2144_s3 + $0x78] sm:$0xff] }
 0x23a   :  { %v471_v8 = vmul.f32 %v462_v57, %v417_v3  ;;  %v1743_v27 = vmax.f32 %v494_v24, 0.0 }
 0x23b   :  { %v421_v10 = vpop.f32.mrf.mxu1 }
 0x23c   :  { %v495_v11 = vadd.f32 %v486_v9, %v471_v8  ;;  %v422_v12 = vadd.f32 %v421_v10, %v325_v53 }
 0x23d   :  { %v423_v14 = vpop.f32.mrf.mxu1 }
 0x23e   :  { %v1734_v18 = vmax.f32 %v495_v11, 0.0  ;;  %v472_v19 = vmul.f32 %v467_v55, %v422_v12 }
 0x240   :  { %v496_v20 = vadd.f32 %v491_v56, %v472_v19  ;;  %529 = vrot.lane.b32.xlu1 %v1734_v18, %s1449_s22  ;;  %v1308_v19 = vld [vmem:[%s2144_s3 + $0x68] sm:$0xff] }
 0x242   :  { %v500_v25 = vmax.f32 %v496_v20, 0.0  ;;  %v1307_v20 = vld [vmem:[%s2144_s3 + $0x60] sm:$0xff] }
 0x244   :  { %531 = vrot.lane.b32.xlu0 %v500_v25, %s1449_s22  ;;  %525 = vrot.lane.b32.xlu1 %v1738_v22, %s1449_s22 }
 0x248   :  { %527 = vrot.lane.b32.xlu0 %v1743_v27, %s1449_s22  ;;  %517 = vrot.lane.b32.xlu1 %v1734_v18, %s1450_s23 }
 0x24c   :  { %519 = vrot.lane.b32.xlu0 %v500_v25, %s1450_s23  ;;  %513 = vrot.lane.b32.xlu1 %v1738_v22, %s1450_s23 }
 0x250   :  { %515 = vrot.lane.b32.xlu0 %v1743_v27, %s1450_s23  ;;  %505 = vrot.lane.b32.xlu1 %v1734_v18, %s1451_s24 }
 0x254   :  { %507 = vrot.lane.b32.xlu0 %v500_v25, %s1451_s24  ;;  %501 = vrot.lane.b32.xlu1 %v1738_v22, %s1451_s24 }
 0x258   :  { %503 = vrot.lane.b32.xlu0 %v1743_v27, %s1451_s24  ;;  %541 = vrot.lane.b32.xlu1 %v1734_v18, %s1452_s25 }
 0x25c   :  { %543 = vrot.lane.b32.xlu0 %v500_v25, %s1452_s25  ;;  %537 = vrot.lane.b32.xlu1 %v1738_v22, %s1452_s25 }
 0x260   :  { %539 = vrot.lane.b32.xlu0 %v1743_v27, %s1452_s25  ;;  %561 = vperm.xlu1 %1414, %v1313_v28  }
 0x264   :  { %566 = vperm.xlu0 %1413, %v1314_v31   ;;  %711 = vperm.xlu1 %1414, %v1322_v32  }
 0x268   :  { %556 = vperm.xlu0 %1413, %v1312_v36   ;;  %706 = vperm.xlu1 %1414, %v1321_v37  }
 0x26c   :  { %551 = vperm.xlu0 %1413, %v1311_v38   ;;  %701 = vperm.xlu1 %1414, %v1320_v40  }
 0x270   :  { %735 = vperm.xlu0 %1413, %v1326_v41   ;;  %696 = vperm.xlu1 %1414, %v1319_v42  }
 0x274   :  { %730 = vperm.xlu0 %1413, %v1325_v43   ;;  %720 = vperm.xlu1 %1414, %v1323_v44  }
 0x278   :  { %725 = vperm.xlu0 %1413, %v1324_v45  }
 0x2b2   :  { %v530_v46 = vpop.permute.xlu1 %529 }
 0x2b3   :  { %v535_v50 = vmul.f32 %v1659_v4, %v530_v46 }
 0x2b6   :  { %v532_v47 = vpop.permute.xlu0 %531  ;;  %v526_v48 = vpop.permute.xlu1 %525 }
 0x2b7   :  { %v536_v49 = vmul.f32 %v1659_v4, %v532_v47  ;;  %v533_v54 = vmul.f32 %v1659_v4, %v526_v48 }
 0x2b9   :  { %582 = vmatpush1.msra.mxu0 %v536_v49 }
 0x2ba   :  { %583 = vmatprep.subr.mxu0 %v1448_v26  ;;  %v528_v51 = vpop.permute.xlu0 %527  ;;  %v518_v53 = vpop.permute.xlu1 %517 }
 0x2bb   :  { %v534_v52 = vmul.f32 %v1659_v4, %v528_v51  ;;  %584 = vmatpush1.msra.mxu0 %v535_v50  ;;  %v523_v61 = vmul.f32 %v1673_v16, %v518_v53 }
 0x2bc   :  { %585 = vmatprep.subr.mxu0 %v1448_v26 }
 0x2bd   :  { %586 = vmatpush1.msra.mxu0 %v534_v52 }
 0x2be   :  { %v520_v55 = vpop.permute.xlu0 %519  ;;  %587 = vmatprep.subr.mxu0 %v1448_v26  ;;  %v514_v56 = vpop.permute.xlu1 %513 }
 0x2bf   :  { %588 = vmatpush1.msra.mxu0 %v533_v54  ;;  %v524_v59 = vmul.f32 %v1673_v16, %v520_v55  ;;  %v521_v0 = vmul.f32 %v1673_v16, %v514_v56 }
 0x2c0   :  { %589 = vmatprep.subr.mxu0 %v1448_v26 }
 0x2c1   :  { %590 = vmatpush1.msra.mxu0 %v500_v25 }
 0x2c2   :  { %v516_v57 = vpop.permute.xlu0 %515  ;;  %591 = vmatprep.subr.mxu0 %v1448_v26  ;;  %v506_v60 = vpop.permute.xlu1 %505 }
 0x2c3   :  { %592 = vmatpush1.msra.mxu0 %v1734_v18  ;;  %v522_v62 = vmul.f32 %v1673_v16, %v516_v57  ;;  %v511_v3 = vmul.f32 %v1685_v23, %v506_v60  ;;  %v1305_v18 = vld [vmem:[%s2144_s3 + $0x50] sm:$0xff] }
 0x2c4   :  { %593 = vmatprep.subr.mxu0 %v1448_v26 }
 0x2c5   :  { %594 = vmatpush1.msra.mxu0 %v1743_v27 }
 0x2c6   :  { %v508_v58 = vpop.permute.xlu0 %507  ;;  %595 = vmatprep.subr.mxu0 %v1448_v26  ;;  %v502_v1 = vpop.permute.xlu1 %501 }
 0x2c7   :  { %596 = vmatpush1.msra.mxu0 %v1738_v22  ;;  %v512_v2 = vmul.f32 %v1685_v23, %v508_v58  ;;  %v509_v8 = vmul.f32 %v1685_v23, %v502_v1  ;;  %v1309_v22 = vld [vmem:[%s2144_s3 + $0x70] sm:$0xff] }
 0x2c8   :  { %597 = vmatprep.subr.mxu0 %v1448_v26 }
 0x2c9   :  { %598 = vmatpush1.msra.mxu0 %v524_v59 }
 0x2ca   :  { %599 = vmatprep.subr.mxu0 %v1448_v26  ;;  %v504_v63 = vpop.permute.xlu0 %503  ;;  %v542_v7 = vpop.permute.xlu1 %541 }
 0x2cb   :  { %600 = vmatpush1.msra.mxu0 %v523_v61  ;;  %v510_v6 = vmul.f32 %v1685_v23, %v504_v63  ;;  %v547_v11 = vmul.f32 %v1696_v35, %v542_v7  ;;  %v1346_v7 = vld [vmem:[%s2146_s5 + $0x78] sm:$0xff] }
 0x2cc   :  { %601 = vmatprep.subr.mxu0 %v1448_v26 }
 0x2cd   :  { %602 = vmatpush1.msra.mxu0 %v522_v62 }
 0x2ce   :  { %603 = vmatprep.subr.mxu0 %v1448_v26  ;;  %v544_v5 = vpop.permute.xlu0 %543  ;;  %v538_v12 = vpop.permute.xlu1 %537 }
 0x2cf   :  { %604 = vmatpush1.msra.mxu0 %v521_v0  ;;  %v548_v9 = vmul.f32 %v1696_v35, %v544_v5  ;;  %v545_v14 = vmul.f32 %v1696_v35, %v538_v12  ;;  %v1338_v5 = vld [vmem:[%s2145_s4 + $0x58] sm:$0xff]  ;;  %v1343_v12 = vld [vmem:[%s2146_s5 + $0x60] sm:$0xff] }
 0x2d0   :  { %605 = vmatprep.subr.mxu0 %v1448_v26 }
 0x2d1   :  { %606 = vmatpush1.msra.mxu0 %v512_v2  ;;  %v1337_v2 = vld [vmem:[%s2145_s4 + $0x50] sm:$0xff] }
 0x2d2   :  { %607 = vmatprep.subr.mxu0 %v1448_v26  ;;  %v540_v10 = vpop.permute.xlu0 %539 }
 0x2d3   :  { %608 = vmatpush1.msra.mxu0 %v511_v3  ;;  %v546_v13 = vmul.f32 %v1696_v35, %v540_v10  ;;  %v1328_v3 = vld [vmem:[%s2144_s3 + $0x88] sm:$0xff] }
 0x2d4   :  { %609 = vmatprep.subr.mxu0 %v1448_v26  ;;  %1339 = vmatprep.mubr.msk.f32.mxu1 %vm327_vm1, %v1328_v3  ;;  %v1344_v10 = vld [vmem:[%s2146_s5 + $0x68] sm:$0xff] }
 0x2d5   :  { %610 = vmatpush1.msra.mxu0 %v510_v6  ;;  %v1336_v6 = vld [vmem:[%s2145_s4 + $0x48] sm:$0xff] }
 0x2d6   :  { %611 = vmatprep.subr.mxu0 %v1448_v26 }
 0x2d7   :  { %612 = vmatpush1.msra.mxu0 %v509_v8  ;;  %v1350_v8 = vld [vmem:[%s2147_s6 + $0x78] sm:$0xff] }
 0x2d8   :  { %637 = vmatprep.subr.mxu0 %v1448_v26 }
 0x2d9   :  { %638 = vmatpush2.msra.mxu0 %v548_v9  ;;  %v1345_v9 = vld [vmem:[%s2146_s5 + $0x70] sm:$0xff] }
 0x2da   :  { %639 = vmatprep.subr.mxu0 %v1448_v26 }
 0x2db   :  { %640 = vmatpush2.msra.mxu0 %v547_v11  ;;  %v562_v24 = vpop.permute.xlu1 %561  ;;  %v1335_v11 = vld [vmem:[%s2145_s4 + $0x40] sm:$0xff] }
 0x2dc   :  { %641 = vmatprep.subr.mxu0 %v1448_v26 }
 0x2dd   :  { %642 = vmatpush2.msra.mxu0 %v546_v13  ;;  %v1349_v13 = vld [vmem:[%s2147_s6 + $0x70] sm:$0xff] }
 0x2de   :  { %643 = vmatprep.subr.mxu0 %v1448_v26 }
 0x2df   :  { %644 = vmatpush2.msra.mxu0 %v545_v14  ;;  %v567_v25 = vpop.permute.xlu0 %566  ;;  %v712_v27 = vpop.permute.xlu1 %711  ;;  %v1347_v14 = vld [vmem:[%s2147_s6 + $0x60] sm:$0xff] }
 0x2e0   :  { %646 = vmatmul.mubr.f32.vlgmr.msra.gmra.mxu0 %v1303_v15  ;;  %1067 = vmatprep.subr.mxu0 %v1448_v26  ;;  %v1348_v15 = vld [vmem:[%s2147_s6 + $0x68] sm:$0xff] }
 0x2e1   :  { %1316 = vmatprep.mubr.msk.f32.mxu0 %vm327_vm1, %v1306_v17 }
 0x2e3   :  { %v557_v28 = vpop.permute.xlu0 %556  ;;  %v707_v29 = vpop.permute.xlu1 %706 }
 0x2e4   :  { %651 = vmatmul.mubr.f32.gmra.mxu0 %v1305_v18 }
 0x2e5   :  { %1317 = vmatprep.mubr.msk.f32.mxu0 %vm327_vm1, %v1308_v19 }
 0x2e7   :  { %v552_v32 = vpop.permute.xlu0 %551  ;;  %v702_v37 = vpop.permute.xlu1 %701 }
 0x2e8   :  { %656 = vmatmul.mubr.f32.gmra.mxu0 %v1307_v20 }
 0x2e9   :  { %1318 = vmatprep.mubr.msk.f32.mxu0 %vm327_vm1, %v1310_v21 }
 0x2eb   :  { %v736_v42 = vpop.permute.xlu0 %735  ;;  %v697_v47 = vpop.permute.xlu1 %696 }
 0x2ec   :  { %661 = vmatmul.mubr.f32.gmra.mxu0 %v1309_v22 }
 0x2ef   :  { %v731_v55 = vpop.permute.xlu0 %730  ;;  %v721_v58 = vpop.permute.xlu1 %720 }
 0x3a0   :  { %v647_v31 = vpop.f32.mrf.mxu0 }
 0x3a1   :  { %v648_v40 = vadd.f32 %v647_v31, %v552_v32 }
 0x3a2   :  { %v649_v36 = vpop.f32.mrf.mxu0 }
 0x3a3   :  { %v1872_v44 = vadd.f32 %v648_v40, %v1568_v33 }
 0x3a4   :  { %v652_v38 = vpop.f32.mrf.mxu0 }
 0x3a5   :  { %v653_v45 = vadd.f32 %v652_v38, %v557_v28  ;;  %v714_v51 = vmul.f32 %v697_v47, %v1872_v44 }
 0x3a6   :  { %v654_v41 = vpop.f32.mrf.mxu0 }
 0x3a7   :  { %v1879_v52 = vadd.f32 %v653_v45, %v1566_v30  ;;  %v738_v59 = vadd.f32 %v721_v58, %v714_v51  ;;  %v726_v30 = vpop.permute.xlu0 %725 }
 0x3a8   :  { %v657_v43 = vpop.f32.mrf.mxu0 }
 0x3a9   :  { %v658_v46 = vadd.f32 %v657_v43, %v562_v24  ;;  %v1891_v63 = vmax.f32 %v738_v59, 0.0  ;;  %v1327_v59 = vld [vmem:[%s2144_s3 + $0x80] sm:$0xff] }
 0x3aa   :  { %v659_v48 = vpop.f32.mrf.mxu0 }
 0x3ab   :  { %v1875_v49 = vadd.f32 %v658_v46, %v1574_v39  ;;  %v715_v39 = vmul.f32 %v702_v37, %v1879_v52 }
 0x3ac   :  { %v662_v50 = vpop.f32.mrf.mxu0 }
 0x3ad   :  { %v716_v53 = vmul.f32 %v707_v29, %v1875_v49  ;;  %v663_v54 = vadd.f32 %v662_v50, %v567_v25  ;;  %v739_v0 = vadd.f32 %v726_v30, %v715_v39  ;;  %v1330_v39 = vld [vmem:[%s2144_s3 + $0x98] sm:$0xff] }
 0x3ae   :  { %v664_v56 = vpop.f32.mrf.mxu0  ;;  %v1334_v30 = vld [vmem:[%s2144_s3 + $0xb8] sm:$0xff] }
 0x3af   :  { %v740_v33 = vadd.f32 %v731_v55, %v716_v53  ;;  %v1883_v57 = vadd.f32 %v663_v54, %v1570_v34  ;;  %v1896_v34 = vmax.f32 %v739_v0, 0.0 }
 0x3b1   :  { %v1886_v60 = vmax.f32 %v740_v33, 0.0  ;;  %v717_v61 = vmul.f32 %v712_v27, %v1883_v57 }
 0x3b3   :  { %v741_v62 = vadd.f32 %v736_v42, %v717_v61  ;;  %774 = vrot.lane.b32.xlu1 %v1886_v60, %s1449_s22  ;;  %v1332_v61 = vld [vmem:[%s2144_s3 + $0xa8] sm:$0xff] }
 0x3b5   :  { %v745_v1 = vmax.f32 %v741_v62, 0.0  ;;  %v1331_v62 = vld [vmem:[%s2144_s3 + $0xa0] sm:$0xff] }
 0x3b7   :  { %776 = vrot.lane.b32.xlu0 %v745_v1, %s1449_s22  ;;  %770 = vrot.lane.b32.xlu1 %v1891_v63, %s1449_s22 }
 0x3bb   :  { %772 = vrot.lane.b32.xlu0 %v1896_v34, %s1449_s22  ;;  %762 = vrot.lane.b32.xlu1 %v1886_v60, %s1450_s23 }
 0x3bf   :  { %764 = vrot.lane.b32.xlu0 %v745_v1, %s1450_s23  ;;  %758 = vrot.lane.b32.xlu1 %v1891_v63, %s1450_s23 }
 0x3c3   :  { %760 = vrot.lane.b32.xlu0 %v1896_v34, %s1450_s23  ;;  %750 = vrot.lane.b32.xlu1 %v1886_v60, %s1451_s24 }
 0x3c7   :  { %752 = vrot.lane.b32.xlu0 %v745_v1, %s1451_s24  ;;  %746 = vrot.lane.b32.xlu1 %v1891_v63, %s1451_s24 }
 0x3cb   :  { %748 = vrot.lane.b32.xlu0 %v1896_v34, %s1451_s24  ;;  %786 = vrot.lane.b32.xlu1 %v1886_v60, %s1452_s25 }
 0x3cf   :  { %788 = vrot.lane.b32.xlu0 %v745_v1, %s1452_s25  ;;  %782 = vrot.lane.b32.xlu1 %v1891_v63, %s1452_s25 }
 0x3d3   :  { %784 = vrot.lane.b32.xlu0 %v1896_v34, %s1452_s25  ;;  %806 = vperm.xlu1 %1414, %v1337_v2  }
 0x3d7   :  { %811 = vperm.xlu0 %1413, %v1338_v5   ;;  %801 = vperm.xlu1 %1414, %v1336_v6  }
 0x3db   :  { %952 = vperm.xlu0 %1413, %v1346_v7   ;;  %976 = vperm.xlu1 %1414, %v1350_v8  }
 0x3df   :  { %947 = vperm.xlu0 %1413, %v1345_v9   ;;  %942 = vperm.xlu1 %1414, %v1344_v10  }
 0x3e3   :  { %796 = vperm.xlu0 %1413, %v1335_v11   ;;  %937 = vperm.xlu1 %1414, %v1343_v12  }
 0x3e7   :  { %971 = vperm.xlu0 %1413, %v1349_v13   ;;  %961 = vperm.xlu1 %1414, %v1347_v14  }
 0x3eb   :  { %966 = vperm.xlu0 %1413, %v1348_v15  }
 0x425   :  { %v775_v17 = vpop.permute.xlu1 %774 }
 0x426   :  { %v780_v21 = vmul.f32 %v1659_v4, %v775_v17 }
 0x429   :  { %v777_v18 = vpop.permute.xlu0 %776  ;;  %v771_v19 = vpop.permute.xlu1 %770 }
 0x42a   :  { %v781_v20 = vmul.f32 %v1659_v4, %v777_v18  ;;  %v778_v27 = vmul.f32 %v1659_v4, %v771_v19 }
 0x42c   :  { %827 = vmatpush1.msra.mxu1 %v781_v20 }
 0x42d   :  { %828 = vmatprep.subr.mxu1 %v1448_v26  ;;  %v773_v22 = vpop.permute.xlu0 %772  ;;  %v763_v25 = vpop.permute.xlu1 %762 }
 0x42e   :  { %v779_v24 = vmul.f32 %v1659_v4, %v773_v22  ;;  %829 = vmatpush1.msra.mxu1 %v780_v21  ;;  %v768_v38 = vmul.f32 %v1673_v16, %v763_v25 }
 0x42f   :  { %830 = vmatprep.subr.mxu1 %v1448_v26 }
 0x430   :  { %831 = vmatpush1.msra.mxu1 %v779_v24 }
 0x431   :  { %v765_v28 = vpop.permute.xlu0 %764  ;;  %832 = vmatprep.subr.mxu1 %v1448_v26  ;;  %v759_v29 = vpop.permute.xlu1 %758 }
 0x432   :  { %833 = vmatpush1.msra.mxu1 %v778_v27  ;;  %v769_v36 = vmul.f32 %v1673_v16, %v765_v28  ;;  %v766_v42 = vmul.f32 %v1673_v16, %v759_v29 }
 0x433   :  { %834 = vmatprep.subr.mxu1 %v1448_v26 }
 0x434   :  { %835 = vmatpush1.msra.mxu1 %v745_v1 }
 0x435   :  { %v761_v31 = vpop.permute.xlu0 %760  ;;  %836 = vmatprep.subr.mxu1 %v1448_v26  ;;  %v751_v37 = vpop.permute.xlu1 %750 }
 0x436   :  { %837 = vmatpush1.msra.mxu1 %v1886_v60  ;;  %v767_v40 = vmul.f32 %v1673_v16, %v761_v31  ;;  %v756_v46 = vmul.f32 %v1685_v23, %v751_v37  ;;  %v1329_v60 = vld [vmem:[%s2144_s3 + $0x90] sm:$0xff] }
 0x437   :  { %838 = vmatprep.subr.mxu1 %v1448_v26 }
 0x438   :  { %839 = vmatpush1.msra.mxu1 %v1896_v34 }
 0x439   :  { %v753_v32 = vpop.permute.xlu0 %752  ;;  %840 = vmatprep.subr.mxu1 %v1448_v26  ;;  %v747_v43 = vpop.permute.xlu1 %746 }
 0x43a   :  { %841 = vmatpush1.msra.mxu1 %v1891_v63  ;;  %v757_v45 = vmul.f32 %v1685_v23, %v753_v32  ;;  %v754_v51 = vmul.f32 %v1685_v23, %v747_v43  ;;  %v1333_v63 = vld [vmem:[%s2144_s3 + $0xb0] sm:$0xff] }
 0x43b   :  { %842 = vmatprep.subr.mxu1 %v1448_v26 }
 0x43c   :  { %843 = vmatpush1.msra.mxu1 %v769_v36 }
 0x43d   :  { %844 = vmatprep.subr.mxu1 %v1448_v26  ;;  %v749_v41 = vpop.permute.xlu0 %748  ;;  %v787_v50 = vpop.permute.xlu1 %786 }
 0x43e   :  { %845 = vmatpush1.msra.mxu1 %v768_v38  ;;  %v755_v48 = vmul.f32 %v1685_v23, %v749_v41  ;;  %v792_v55 = vmul.f32 %v1696_v35, %v787_v50  ;;  %v1360_v50 = vld [vmem:[%s2145_s4 + $0x68] sm:$0xff] }
 0x43f   :  { %846 = vmatprep.subr.mxu1 %v1448_v26 }
 0x440   :  { %847 = vmatpush1.msra.mxu1 %v767_v40 }
 0x441   :  { %848 = vmatprep.subr.mxu1 %v1448_v26  ;;  %v789_v47 = vpop.permute.xlu0 %788  ;;  %v783_v56 = vpop.permute.xlu1 %782 }
 0x442   :  { %849 = vmatpush1.msra.mxu1 %v766_v42  ;;  %v793_v53 = vmul.f32 %v1696_v35, %v789_v47  ;;  %v790_v58 = vmul.f32 %v1696_v35, %v783_v56  ;;  %v1362_v47 = vld [vmem:[%s2145_s4 + $0x78] sm:$0xff] }
 0x443   :  { %850 = vmatprep.subr.mxu1 %v1448_v26 }
 0x444   :  { %851 = vmatpush1.msra.mxu1 %v757_v45  ;;  %v1361_v45 = vld [vmem:[%s2145_s4 + $0x70] sm:$0xff] }
 0x445   :  { %852 = vmatprep.subr.mxu1 %v1448_v26  ;;  %v785_v54 = vpop.permute.xlu0 %784 }
 0x446   :  { %853 = vmatpush1.msra.mxu1 %v756_v46  ;;  %v791_v33 = vmul.f32 %v1696_v35, %v785_v54  ;;  %v1352_v46 = vld [vmem:[%s2144_s3 + $0xc8] sm:$0xff] }
 0x447   :  { %854 = vmatprep.subr.mxu1 %v1448_v26  ;;  %1363 = vmatprep.mubr.msk.f32.mxu0 %vm327_vm1, %v1352_v46 }
 0x448   :  { %855 = vmatpush1.msra.mxu1 %v755_v48  ;;  %v1359_v48 = vld [vmem:[%s2145_s4 + $0x60] sm:$0xff] }
 0x449   :  { %856 = vmatprep.subr.mxu1 %v1448_v26 }
 0x44a   :  { %857 = vmatpush1.msra.mxu1 %v754_v51  ;;  %v1159_v51 = vld [vmem:[%s2149_s8 + $0x8] sm:$0xff] }
 0x44b   :  { %882 = vmatprep.subr.mxu1 %v1448_v26 }
 0x44c   :  { %883 = vmatpush2.msra.mxu1 %v793_v53  ;;  %v1158_v53 = vld [vmem:[%s2149_s8] sm:$0xff] }
 0x44d   :  { %884 = vmatprep.subr.mxu1 %v1448_v26 }
 0x44e   :  { %885 = vmatpush2.msra.mxu1 %v792_v55  ;;  %v807_v0 = vpop.permute.xlu1 %806 }
 0x44f   :  { %886 = vmatprep.subr.mxu1 %v1448_v26 }
 0x450   :  { %887 = vmatpush2.msra.mxu1 %v791_v33 }
 0x451   :  { %888 = vmatprep.subr.mxu1 %v1448_v26 }
 0x452   :  { %889 = vmatpush2.msra.mxu1 %v790_v58  ;;  %v812_v1 = vpop.permute.xlu0 %811  ;;  %v802_v34 = vpop.permute.xlu1 %801 }
 0x453   :  { %891 = vmatmul.mubr.f32.vlgmr.msra.gmra.mxu1 %v1327_v59 }
 0x454   :  { %1340 = vmatprep.mubr.msk.f32.mxu1 %vm327_vm1, %v1330_v39 }
 0x456   :  { %v953_v2 = vpop.permute.xlu0 %952  ;;  %v977_v3 = vpop.permute.xlu1 %976 }
 0x457   :  { %896 = vmatmul.mubr.f32.gmra.mxu1 %v1329_v60 }
 0x458   :  { %1341 = vmatprep.mubr.msk.f32.mxu1 %vm327_vm1, %v1332_v61 }
 0x45a   :  { %v948_v5 = vpop.permute.xlu0 %947  ;;  %v943_v7 = vpop.permute.xlu1 %942 }
 0x45b   :  { %901 = vmatmul.mubr.f32.gmra.mxu1 %v1331_v62 }
 0x45c   :  { %1342 = vmatprep.mubr.msk.f32.mxu1 %vm327_vm1, %v1334_v30 }
 0x45e   :  { %v797_v10 = vpop.permute.xlu0 %796  ;;  %v938_v13 = vpop.permute.xlu1 %937 }
 0x45f   :  { %906 = vmatmul.mubr.f32.gmra.mxu1 %v1333_v63 }
 0x462   :  { %v972_v21 = vpop.permute.xlu0 %971  ;;  %v962_v27 = vpop.permute.xlu1 %961 }
 0x466   :  { %v967_v38 = vpop.permute.xlu0 %966 }
 0x513   :  { %v892_v6 = vpop.f32.mrf.mxu1 }
 0x514   :  { %v893_v12 = vadd.f32 %v892_v6, %v797_v10 }
 0x515   :  { %v894_v8 = vpop.f32.mrf.mxu1 }
 0x516   :  { %v955_v18 = vmul.f32 %v938_v13, %v893_v12 }
 0x517   :  { %v897_v9 = vpop.f32.mrf.mxu1 }
 0x518   :  { %v898_v19 = vadd.f32 %v897_v9, %v802_v34  ;;  %v979_v29 = vadd.f32 %v962_v27, %v955_v18  ;;  %v1351_v18 = vld [vmem:[%s2144_s3 + $0xc0] sm:$0xff] }
 0x519   :  { %v899_v11 = vpop.f32.mrf.mxu1 }
 0x51a   :  { %v956_v31 = vmul.f32 %v943_v7, %v898_v19  ;;  %v983_v40 = vmax.f32 %v979_v29, 0.0  ;;  %v1354_v19 = vld [vmem:[%s2144_s3 + $0xd8] sm:$0xff] }
 0x51b   :  { %v902_v14 = vpop.f32.mrf.mxu1 }
 0x51c   :  { %v903_v15 = vadd.f32 %v902_v14, %v807_v0  ;;  %v980_v41 = vadd.f32 %v967_v38, %v956_v31 }
 0x51d   :  { %v904_v17 = vpop.f32.mrf.mxu1 }
 0x51e   :  { %v957_v20 = vmul.f32 %v948_v5, %v903_v15  ;;  %v984_v43 = vmax.f32 %v980_v41, 0.0 }
 0x51f   :  { %v907_v22 = vpop.f32.mrf.mxu1 }
 0x520   :  { %v981_v24 = vadd.f32 %v972_v21, %v957_v20  ;;  %v908_v25 = vadd.f32 %v907_v22, %v812_v1  ;;  %v1353_v20 = vld [vmem:[%s2144_s3 + $0xd0] sm:$0xff]  ;;  %v1358_v21 = vld [vmem:[%s2144_s3 + $0xf8] sm:$0xff] }
 0x521   :  { %v909_v28 = vpop.f32.mrf.mxu1  ;;  %v1357_v22 = vld [vmem:[%s2144_s3 + $0xf0] sm:$0xff] }
 0x522   :  { %v985_v32 = vmax.f32 %v981_v24, 0.0  ;;  %v958_v36 = vmul.f32 %v953_v2, %v908_v25  ;;  %v1156_v24 = vld [vmem:[%s2148_s7] sm:$0xff] }
 0x523   :  { %1401 = vmatprep.mubr.msk.f32.mxu1 %vm327_vm1, %v1156_v24 }
 0x524   :  { %v982_v37 = vadd.f32 %v977_v3, %v958_v36  ;;  %1015 = vrot.lane.b32.xlu1 %v985_v32, %s1449_s22 }
 0x526   :  { %v986_v42 = vmax.f32 %v982_v37, 0.0 }
 0x528   :  { %1017 = vrot.lane.b32.xlu0 %v986_v42, %s1449_s22  ;;  %1011 = vrot.lane.b32.xlu1 %v983_v40, %s1449_s22 }
 0x52c   :  { %1013 = vrot.lane.b32.xlu0 %v984_v43, %s1449_s22  ;;  %1003 = vrot.lane.b32.xlu1 %v985_v32, %s1450_s23 }
 0x530   :  { %1005 = vrot.lane.b32.xlu0 %v986_v42, %s1450_s23  ;;  %999 = vrot.lane.b32.xlu1 %v983_v40, %s1450_s23 }
 0x534   :  { %1001 = vrot.lane.b32.xlu0 %v984_v43, %s1450_s23  ;;  %991 = vrot.lane.b32.xlu1 %v985_v32, %s1451_s24 }
 0x538   :  { %993 = vrot.lane.b32.xlu0 %v986_v42, %s1451_s24  ;;  %987 = vrot.lane.b32.xlu1 %v983_v40, %s1451_s24 }
 0x53c   :  { %989 = vrot.lane.b32.xlu0 %v984_v43, %s1451_s24  ;;  %1027 = vrot.lane.b32.xlu1 %v985_v32, %s1452_s25 }
 0x540   :  { %1029 = vrot.lane.b32.xlu0 %v986_v42, %s1452_s25  ;;  %1023 = vrot.lane.b32.xlu1 %v983_v40, %s1452_s25 }
 0x544   :  { %1025 = vrot.lane.b32.xlu0 %v984_v43, %s1452_s25  ;;  %1047 = vperm.xlu1 %1414, %v1361_v45  }
 0x548   :  { %1052 = vperm.xlu0 %1413, %v1362_v47   ;;  %1037 = vperm.xlu1 %1414, %v1359_v48  }
 0x54c   :  { %1042 = vperm.xlu0 %1413, %v1360_v50   ;;  %1167 = vperm.xlu1 %1414, %v1159_v51  }
 0x550   :  { %1162 = vperm.xlu0 %1413, %v1158_v53  }
 0x596   :  { %v1016_v54 = vpop.permute.xlu1 %1015 }
 0x597   :  { %v1021_v58 = vmul.f32 %v1659_v4, %v1016_v54  ;;  %v1157_v54 = vld [vmem:[%s2148_s7 + $0x8] sm:$0xff]  ;;  %s1453_s7 = smov [#allocation2]  }
 0x598   :  { %s1272_s24 = sshll.u32 %s1453_s7, 4  ;;  %s1273_s24 = int_to_ptr.vmem [resolvable:$true] %s1272_s24 }
 0x599   :  { %s1425_s14 = scalar_lea.vmem %s1273_s24, 256  ;;  %p1430_p1 = scmp.lt.s32.totalorder %s1273_s24, %s1273_s24 }
 0x59a   :  { %v1018_v55 = vpop.permute.xlu0 %1017  ;;  %v1012_v56 = vpop.permute.xlu1 %1011  ;;  %p1426_p0 = scmp.ne.s32.totalorder %s1273_s24, %s1425_s14  ;;  %p1431_p2 = scmp.lt.s32.totalorder %s1425_s14, %s1425_s14 }
 0x59b   :  { %v1022_v33 = vmul.f32 %v1659_v4, %v1018_v55  ;;  %v1019_v61 = vmul.f32 %v1659_v4, %v1012_v56 }
 0x59c   :  { %p1432_p3 = por %p1431_p2, %p1430_p1 }
 0x59d   :  { %1068 = vmatpush1.msra.mxu0 %v1022_v33 }
 0x59e   :  { %1069 = vmatprep.subr.mxu0 %v1448_v26  ;;  %v1014_v59 = vpop.permute.xlu0 %1013  ;;  %v1004_v60 = vpop.permute.xlu1 %1003  ;;  %p1433_p4 = pnand %p1432_p3, %p1426_p0 }
 0x59f   :  { %v1020_v39 = vmul.f32 %v1659_v4, %v1014_v59  ;;  %1070 = vmatpush1.msra.mxu0 %v1021_v58  ;;  %v1009_v34 = vmul.f32 %v1673_v16, %v1004_v60 }
 0x5a0   :  { %1071 = vmatprep.subr.mxu0 %v1448_v26 }
 0x5a1   :  { %1072 = vmatpush1.msra.mxu0 %v1020_v39 }
 0x5a2   :  { %v1006_v62 = vpop.permute.xlu0 %1005  ;;  %1073 = vmatprep.subr.mxu0 %v1448_v26  ;;  %v1000_v30 = vpop.permute.xlu1 %999 }
 0x5a3   :  { %1074 = vmatpush1.msra.mxu0 %v1019_v61  ;;  %v1010_v4 = vmul.f32 %v1673_v16, %v1006_v62  ;;  %v1007_v5 = vmul.f32 %v1673_v16, %v1000_v30  ;;  %v1423_v30 = vld [vmem:[%s2141_s0 + $0x8] sm:$0xff] }
 0x5a4   :  { %1075 = vmatprep.subr.mxu0 %v1448_v26 }
 0x5a5   :  { %1076 = vmatpush1.msra.mxu0 %v986_v42 }
 0x5a6   :  { %v1002_v63 = vpop.permute.xlu0 %1001  ;;  %1077 = vmatprep.subr.mxu0 %v1448_v26  ;;  %v992_v1 = vpop.permute.xlu1 %991 }
 0x5a7   :  { %1078 = vmatpush1.msra.mxu0 %v985_v32  ;;  %v1008_v2 = vmul.f32 %v1673_v16, %v1002_v63  ;;  %v997_v8 = vmul.f32 %v1685_v23, %v992_v1 }
 0x5a8   :  { %1079 = vmatprep.subr.mxu0 %v1448_v26 }
 0x5a9   :  { %1080 = vmatpush1.msra.mxu0 %v984_v43 }
 0x5aa   :  { %v994_v0 = vpop.permute.xlu0 %993  ;;  %1081 = vmatprep.subr.mxu0 %v1448_v26  ;;  %v988_v6 = vpop.permute.xlu1 %987 }
 0x5ab   :  { %1082 = vmatpush1.msra.mxu0 %v983_v40  ;;  %v998_v7 = vmul.f32 %v1685_v23, %v994_v0  ;;  %v995_v16 = vmul.f32 %v1685_v23, %v988_v6 }
 0x5ac   :  { %1083 = vmatprep.subr.mxu0 %v1448_v26 }
 0x5ad   :  { %1084 = vmatpush1.msra.mxu0 %v1010_v4  ;;  %v1424_v4 = vld [vmem:[%s2141_s0] sm:$0xff] }
 0x5ae   :  { %1085 = vmatprep.subr.mxu0 %v1448_v26  ;;  %v990_v3 = vpop.permute.xlu0 %989  ;;  %v1028_v11 = vpop.permute.xlu1 %1027 }
 0x5af   :  { %1086 = vmatpush1.msra.mxu0 %v1009_v34  ;;  %v996_v10 = vmul.f32 %v1685_v23, %v990_v3  ;;  %v1033_v14 = vmul.f32 %v1696_v35, %v1028_v11 }
 0x5b0   :  { %1087 = vmatprep.subr.mxu0 %v1448_v26 }
 0x5b1   :  { %1088 = vmatpush1.msra.mxu0 %v1008_v2 }
 0x5b2   :  { %1089 = vmatprep.subr.mxu0 %v1448_v26  ;;  %v1030_v9 = vpop.permute.xlu0 %1029  ;;  %v1024_v15 = vpop.permute.xlu1 %1023 }
 0x5b3   :  { %1090 = vmatpush1.msra.mxu0 %v1007_v5  ;;  %v1034_v12 = vmul.f32 %v1696_v35, %v1030_v9  ;;  %v1031_v23 = vmul.f32 %v1696_v35, %v1024_v15 }
 0x5b4   :  { %1091 = vmatprep.subr.mxu0 %v1448_v26 }
 0x5b5   :  { %1092 = vmatpush1.msra.mxu0 %v998_v7 }
 0x5b6   :  { %1093 = vmatprep.subr.mxu0 %v1448_v26  ;;  %v1026_v13 = vpop.permute.xlu0 %1025 }
 0x5b7   :  { %1094 = vmatpush1.msra.mxu0 %v997_v8  ;;  %v1032_v17 = vmul.f32 %v1696_v35, %v1026_v13  ;;  %v1356_v35 = vld [vmem:[%s2144_s3 + $0xe8] sm:$0xff] }
 0x5b8   :  { %1095 = vmatprep.subr.mxu0 %v1448_v26 }
 0x5b9   :  { %1096 = vmatpush1.msra.mxu0 %v996_v10 }
 0x5ba   :  { %1097 = vmatprep.subr.mxu0 %v1448_v26 }
 0x5bb   :  { %1098 = vmatpush1.msra.mxu0 %v995_v16 }
 0x5bc   :  { %1123 = vmatprep.subr.mxu0 %v1448_v26 }
 0x5bd   :  { %1124 = vmatpush2.msra.mxu0 %v1034_v12 }
 0x5be   :  { %1125 = vmatprep.subr.mxu0 %v1448_v26 }
 0x5bf   :  { %1126 = vmatpush2.msra.mxu0 %v1033_v14  ;;  %v1048_v36 = vpop.permute.xlu1 %1047 }
 0x5c0   :  { %1127 = vmatprep.subr.mxu0 %v1448_v26 }
 0x5c1   :  { %1128 = vmatpush2.msra.mxu0 %v1032_v17 }
 0x5c2   :  { %1129 = vmatprep.subr.mxu0 %v1448_v26  ;;  %v1355_v26 = vld [vmem:[%s2144_s3 + $0xe0] sm:$0xff] }
 0x5c3   :  { %1130 = vmatpush2.msra.mxu0 %v1031_v23  ;;  %v1053_v31 = vpop.permute.xlu0 %1052  ;;  %v1038_v47 = vpop.permute.xlu1 %1037 }
 0x5c4   :  { %1132 = vmatmul.mubr.f32.vlgmr.msra.gmra.mxu0 %v1351_v18 }
 0x5c5   :  { %1364 = vmatprep.mubr.msk.f32.mxu0 %vm327_vm1, %v1354_v19 }
 0x5c7   :  { %v1043_v42 = vpop.permute.xlu0 %1042 }
 0x5c8   :  { %1137 = vmatmul.mubr.f32.gmra.mxu0 %v1353_v20 }
 0x5c9   :  { %1365 = vmatprep.mubr.msk.f32.mxu0 %vm327_vm1, %v1356_v35 }
 0x5cb   :  { %v1163_v56 = vpop.permute.xlu0 %1162 }
 0x5cc   :  { %1142 = vmatmul.mubr.f32.gmra.mxu0 %v1355_v26 }
 0x5cd   :  { %1366 = vmatprep.mubr.msk.f32.mxu0 %vm327_vm1, %v1358_v21 }
 0x5d0   :  { %1147 = vmatmul.mubr.f32.gmra.mxu0 %v1357_v22 }
 0x684   :  { %v1133_v25 = vpop.f32.mrf.mxu0 }
 0x685   :  { %v1134_v48 = vadd.f32 %v1133_v25, %v1038_v47 }
 0x686   :  { %v1135_v27 = vpop.f32.mrf.mxu0 }
 0x687   :  { %v1152_v53 = vadd.f32 %v1134_v48, %v1872_v44 }
 0x688   :  { %v1138_v28 = vpop.f32.mrf.mxu0 }
 0x689   :  { %v1139_v45 = vadd.f32 %v1138_v28, %v1043_v42 }
 0x68a   :  { %v1140_v29 = vpop.f32.mrf.mxu0 }
 0x68b   :  { %v1153_v51 = vadd.f32 %v1139_v45, %v1879_v52 }
 0x68c   :  { %v1143_v32 = vpop.f32.mrf.mxu0 }
 0x68d   :  { %v1144_v40 = vadd.f32 %v1143_v32, %v1048_v36 }
 0x68e   :  { %v1145_v37 = vpop.f32.mrf.mxu0 }
 0x68f   :  { %v1154_v50 = vadd.f32 %v1144_v40, %v1875_v49 }
 0x690   :  { %v1148_v38 = vpop.f32.mrf.mxu0 }
 0x691   :  { %v1149_v41 = vadd.f32 %v1148_v38, %v1053_v31 }
 0x692   :  { %v1150_v43 = vpop.f32.mrf.mxu0 }
 0x693   :  { %v1155_v46 = vadd.f32 %v1149_v41, %v1883_v57  ;;  %v1168_v57 = vpop.permute.xlu1 %1167 }
 0x695   :  { %1393 = vmatprep.subr.mxu1 %v1155_v46 }
 0x696   :  { %1394 = vmatpush3.msra.mxu1 %v1155_v46 }
 0x697   :  { %1395 = vmatprep.subr.mxu1 %v1154_v50 }
 0x698   :  { %1396 = vmatpush3.msra.mxu1 %v1154_v50 }
 0x699   :  { %1397 = vmatprep.subr.mxu1 %v1153_v51 }
 0x69a   :  { %1398 = vmatpush3.msra.mxu1 %v1153_v51 }
 0x69b   :  { %1399 = vmatprep.subr.mxu1 %v1152_v53 }
 0x69c   :  { %1400 = vmatpush3.msra.mxu1 %v1152_v53 }
 0x69d   :  { %1402 = vmatmul.mubr.msk.f32.vlgmr.msra.gmra.mxu1 %vm327_vm1, %v1157_v54 }
 0x75d   :  { %v1403_v49 = vpop.f32.mrf.mxu1 }
 0x75e   :  { %v1248_v55 = vadd.f32 %v1403_v49, %v1168_v57 }
 0x75f   :  { %v1242_v33 = vpop.f32.mrf.mxu1 }
 0x760   :  { %v1370_v52 = vmul.f32 -1.442695, %v1248_v55  ;;  %v1243_v58 = vadd.f32 %v1242_v33, %v1163_v56 }
 0x762   :  { %1415 = vpow2.f32 %v1370_v52  ;;  %v1369_v59 = vmul.f32 -1.442695, %v1243_v58 }
 0x764   :  { %1417 = vpow2.f32 %v1369_v59 }
 0x76f   :  { %v1416_v44 = vpop.eup %1415 }
 0x770   :  { %v1258_v39 = vadd.f32 1.0, %v1416_v44 }
 0x771   :  { %v1418_v60 = vpop.eup %1417 }
 0x772   :  { %1419 = vrcp.f32 %v1258_v39  ;;  %v1257_v61 = vadd.f32 1.0, %v1418_v60 }
 0x774   :  { %1421 = vrcp.f32 %v1257_v61 }
 0x77f   :  { %v1420_v62 = vpop.eup %1419 }
 0x780   :  { %v1264_v63 = vmul.f32 %v1423_v30, %v1420_v62 }
 0x781   :  { %v1422_v0 = vpop.eup %1421 }
 0x782   :  { %v1263_v1 = vmul.f32 %v1424_v4, %v1422_v0  ;;  %1266 = vst [vmem:[#allocation2 + $0x8] sm:$0xff] %v1264_v63 }
 0x784   :  { %1265 = vst [vmem:[#allocation2] sm:$0xff] %v1263_v1 }
 0x785   :  { %1436 = shalt.err (!%p1433_p4)
}
 0x786   :  { %s1454_s5 = smov 128   ;;  %s1455_s6 = smov 8  }
 0x787   :  { %1278 = dma.vmem_to_hbm [thread:$0]  %s1273_s24, 256, %s2150_s9, [#allocation3], %s1454_s5, %s1454_s5, %s1455_s6  }
 0x788   :  { %1445 = dma.done.wait [#allocation3], 256  }
 0x789   :  { %1446 = vsyncadd [#allocation3], 4294967040 }
 0x78a   :  { %1282 = vsyncpa [#allocation3], 1 }

</bundles_post_ra>
